<compile_context>
chip_gen: v7x
topology: tpu7x:2x2x1
jax: 0.10.0
libtpu: 0.0.40
codegen_flags: <defaults>
</compile_context>

<pallas_src>
import functools

import jax
import jax.numpy as jnp
import numpy as np
from jax.experimental import pallas as pl
from jax.experimental.pallas import tpu as pltpu

MATMUL_DTYPE = jnp.bfloat16     # MXU operand dtype (accumulation stays f32)
TILE_B = 8                      # batch rows per grid step (one sublane tile)


# -----------------------------------------------------------------------------
# Fused kernel: table LSTM + statement LSTM + classification head.
# -----------------------------------------------------------------------------
def _fused_kernel(xt_ref, xs_ref, w_ih_t_ref, w_ih_s_ref, b_t_ref, b_s_ref,
                  w_hh_ref, fc1_w_ref, fc1_b_ref, fc2_w_ref, fc2_b_ref,
                  out_ref, gxt_ref, gxs_ref, *, t_tab, t_stmt, hidden):
    H = hidden
    t_max = max(t_tab, t_stmt)
    f32 = jnp.float32

    # ---- Phase 1: input projections, hoisted out of the recurrence ---------
    # (T*TILE_B, E) @ (E, 4H) + b  ->  f32 VMEM scratch (right-sized per seq).
    gxt_ref[...] = jnp.dot(xt_ref[0], w_ih_t_ref[...],
                           preferred_element_type=f32) + b_t_ref[...]
    gxs_ref[...] = jnp.dot(xs_ref[0], w_ih_s_ref[...],
                           preferred_element_type=f32) + b_s_ref[...]

    # Fused block-diagonal recurrent weight (2H, 8H), loaded once.
    w_hh = w_hh_ref[...]
    cdt = w_hh.dtype

    def x_gate_offset(t, t_len):
        # Clamp the read for the shorter sequence; the update is discarded by
        # the freeze select anyway (static: no clamp for the longest sequence).
        idx = jnp.minimum(t, t_len - 1) if t_len < t_max else t
        return pl.multiple_of(idx * TILE_B, TILE_B)

    def step(t, carry):
        h_t, c_t, h_s, c_s = carry
        # ONE recurrent matmul per step: [h_t | h_s] @ block-diag W_hh.
        h_cat = jnp.concatenate([h_t, h_s], axis=1).astype(cdt)     # (B, 2H)
        rec = jnp.dot(h_cat, w_hh, preferred_element_type=f32)      # (B, 8H)
        gx_t = gxt_ref[pl.ds(x_gate_offset(t, t_tab), TILE_B), :]
        gx_s = gxs_ref[pl.ds(x_gate_offset(t, t_stmt), TILE_B), :]
        # Gate layout: [g_t | i_t f_t o_t | i_s f_s o_s | g_s] — the x-gate
        # concat is two full 128-lane blocks, and the 6H sigmoid lanes are
        # contiguous (one sigmoid + two tanh for all gates).
        g = jnp.concatenate([gx_t, gx_s], axis=1) + rec
        g_t = jnp.tanh(g[:, :H])
        sig = jax.nn.sigmoid(g[:, H:7 * H])
        g_s = jnp.tanh(g[:, 7 * H:])
        i_t, f_t, o_t = sig[:, 0*H:1*H], sig[:, 1*H:2*H], sig[:, 2*H:3*H]
        i_s, f_s, o_s = sig[:, 3*H:4*H], sig[:, 4*H:5*H], sig[:, 5*H:6*H]
        c_t_new = f_t * c_t + i_t * g_t
        c_s_new = f_s * c_s + i_s * g_s
        h_t_new = o_t * jnp.tanh(c_t_new)
        h_s_new = o_s * jnp.tanh(c_s_new)
        # Freeze whichever sequence has already ended (static check: the
        # longest sequence compiles with no select at all).
        if t_tab < t_max:
            upd = t < t_tab
            h_t_new = jnp.where(upd, h_t_new, h_t)
            c_t_new = jnp.where(upd, c_t_new, c_t)
        if t_stmt < t_max:
            upd = t < t_stmt
            h_s_new = jnp.where(upd, h_s_new, h_s)
            c_s_new = jnp.where(upd, c_s_new, c_s)
        return h_t_new, c_t_new, h_s_new, c_s_new

    zeros = jnp.zeros((TILE_B, H), f32)
    # Full unroll only for short sequences; bounded unroll avoids instruction
    # bloat / vreg spills for long T while still pipelining across iterations.
    unroll = True if t_max <= 16 else 4
    h_t, _, h_s, _ = jax.lax.fori_loop(
        0, t_max, step, (zeros, zeros, zeros, zeros), unroll=unroll)

    # ---- Head: fc1 (single (2H,H) matmul) -> relu -> fc2 (VPU mul + reduce) -
    # Dropout is identity at inference time.
    hc = jnp.concatenate([h_t, h_s], axis=1)
    hid = jnp.dot(hc.astype(cdt), fc1_w_ref[...],
                  preferred_element_type=f32) + fc1_b_ref[...]
    hid = jnp.maximum(hid, 0.0)
    # fc2 has N=1: a broadcast multiply + lane-sum avoids an MXU pass.
    logits = jnp.sum(hid * fc2_w_ref[...], axis=1, keepdims=True) + fc2_b_ref[...]
    out_ref[...] = logits


# -----------------------------------------------------------------------------
# Wrapper
# -----------------------------------------------------------------------------
def table_statement_rnn_forward(kparams, table_embeddings, statement_embeddings):
    B, t_tab, E = table_embeddings.shape
    _, t_stmt, _ = statement_embeddings.shape
    H = kparams["fc1_b"].shape[-1]
    cdt = kparams["w_hh"].dtype

    bp = ((B + TILE_B - 1) // TILE_B) * TILE_B
    n_bt = bp // TILE_B

    def prep(x, t_len):
        # (B, T, E) -> (n_bt, T*TILE_B, E): batch-tiled, time-major inside the
        # tile (row t*TILE_B + b), zero-padded batch, cast to the MXU dtype.
        x = jnp.pad(x, ((0, bp - B), (0, 0), (0, 0)))
        x = x.reshape(n_bt, TILE_B, t_len, E)
        x = jnp.transpose(x, (0, 2, 1, 3))
        return x.reshape(n_bt, t_len * TILE_B, E).astype(cdt)

    xt = prep(table_embeddings, t_tab)
    xs = prep(statement_embeddings, t_stmt)

    weight_names = ("w_ih_t", "w_ih_s", "b_t", "b_s", "w_hh",
                    "fc1_w", "fc1_b", "fc2_w", "fc2_b")
    weights = [kparams[k] for k in weight_names]

    def full_spec(a):
        return pl.BlockSpec(a.shape, lambda i, _n=a.ndim: (0,) * _n)

    in_specs = ([pl.BlockSpec((1, t_tab * TILE_B, E), lambda i: (i, 0, 0)),
                 pl.BlockSpec((1, t_stmt * TILE_B, E), lambda i: (i, 0, 0))]
                + [full_spec(w) for w in weights])
    out_spec = pl.BlockSpec((TILE_B, 1), lambda i: (i, 0))

    # Derive the VMEM budget from the actual footprint (scratch + double-
    # buffered inputs + weights) rather than hard-coding a per-chip value.
    # TODO(synk): for very long sequences (scratch > ~half of v7x's 64 MiB)
    # the projections should be chunked/pipelined over time instead.
    itemsize = jnp.dtype(cdt).itemsize
    scratch_bytes = (t_tab + t_stmt) * TILE_B * 4 * H * 4
    input_bytes = 2 * ((t_tab + t_stmt) * TILE_B * E * itemsize + TILE_B * 4)
    weight_bytes = 2 * sum(int(w.size) * w.dtype.itemsize for w in weights)
    est = scratch_bytes + input_bytes + weight_bytes
    vmem_limit = int(min(max(2 * est, 16 * 2**20), 112 * 2**20))

    kernel = functools.partial(_fused_kernel, t_tab=t_tab, t_stmt=t_stmt,
                               hidden=H)
    out = pl.pallas_call(
        kernel,
        out_shape=jax.ShapeDtypeStruct((bp, 1), jnp.float32),
        grid=(n_bt,),
        in_specs=in_specs,
        out_specs=out_spec,
        scratch_shapes=[
            pltpu.VMEM((t_tab * TILE_B, 4 * H), jnp.float32),   # table x-proj
            pltpu.VMEM((t_stmt * TILE_B, 4 * H), jnp.float32),  # stmt  x-proj
        ],
        compiler_params=pltpu.CompilerParams(
            dimension_semantics=("parallel",),       # batch tiles -> 2 TCs on v7x
            vmem_limit_bytes=vmem_limit),
    )(xt, xs, *weights)
    return out[:B]


# -----------------------------------------------------------------------------
# Parameters: PyTorch layout (for the reference) + kernel-layout conversion.
# -----------------------------------------------------------------------------
def init_torch_params(key, embedding_dim, hidden_dim):
    """PyTorch-layout parameters (nn.LSTM / nn.Linear shapes & init ranges)."""
    H, E = hidden_dim, embedding_dim
    ks = jax.random.split(key, 12)
    bl = 1.0 / np.sqrt(H)

    def u(k, shape, bound):
        return jax.random.uniform(k, shape, jnp.float32, -bound, bound)

    return {
        # table LSTM (gate row order [i, f, g, o], as in PyTorch)
        "t_w_ih": u(ks[0], (4 * H, E), bl), "t_w_hh": u(ks[1], (4 * H, H), bl),
        "t_b_ih": u(ks[2], (4 * H,), bl),   "t_b_hh": u(ks[3], (4 * H,), bl),
        # statement LSTM
        "s_w_ih": u(ks[4], (4 * H, E), bl), "s_w_hh": u(ks[5], (4 * H, H), bl),
        "s_b_ih": u(ks[6], (4 * H,), bl),   "s_b_hh": u(ks[7], (4 * H,), bl),
        # fc1: 2H -> H, fc2: H -> 1
        "fc1_w": u(ks[8], (H, 2 * H), 1.0 / np.sqrt(2 * H)),
        "fc1_b": u(ks[9], (H,), 1.0 / np.sqrt(2 * H)),
        "fc2_w": u(ks[10], (1, H), 1.0 / np.sqrt(H)),
        "fc2_b": u(ks[11], (1,), 1.0 / np.sqrt(H)),
    }


def prepare_kernel_params(p, dtype=MATMUL_DTYPE):
    """PyTorch layout -> kernel layout.

    Gate permutations: table [i,f,g,o]->[g,i,f,o], statement [i,f,g,o]->[i,f,o,g]
    so the fused 8H gate vector is [g_t | i_t f_t o_t | i_s f_s o_s | g_s]
    (one contiguous 6H sigmoid range).  b_ih+b_hh are fused, the two recurrent
    weights become one block-diagonal (2H,8H) matrix, fc1 is one (2H,H) matmul
    and fc2 stays an f32 row for the VPU reduce."""
    H = p["t_w_hh"].shape[1]

    def perm_tab(m):   # rows [i, f, g, o] -> [g, i, f, o]
        return jnp.concatenate([m[2*H:3*H], m[0:H], m[H:2*H], m[3*H:4*H]], axis=0)

    def perm_stm(m):   # rows [i, f, g, o] -> [i, f, o, g]
        return jnp.concatenate([m[0:2*H], m[3*H:4*H], m[2*H:3*H]], axis=0)

    w_hh = jnp.zeros((2 * H, 8 * H), jnp.float32)
    w_hh = w_hh.at[:H, :4 * H].set(perm_tab(p["t_w_hh"]).T)
    w_hh = w_hh.at[H:, 4 * H:].set(perm_stm(p["s_w_hh"]).T)

    return {
        "w_ih_t": perm_tab(p["t_w_ih"]).T.astype(dtype),                  # (E, 4H)
        "w_ih_s": perm_stm(p["s_w_ih"]).T.astype(dtype),                  # (E, 4H)
        "b_t": perm_tab(p["t_b_ih"] + p["t_b_hh"])[None, :].astype(jnp.float32),
        "b_s": perm_stm(p["s_b_ih"] + p["s_b_hh"])[None, :].astype(jnp.float32),
        "w_hh": w_hh.astype(dtype),                                       # (2H, 8H)
        "fc1_w": p["fc1_w"].T.astype(dtype),                              # (2H, H)
        "fc1_b": p["fc1_b"][None, :].astype(jnp.float32),                 # (1, H)
        "fc2_w": p["fc2_w"].astype(jnp.float32),                          # (1, H)
        "fc2_b": p["fc2_b"][None, :].astype(jnp.float32),                 # (1, 1)
    }


# -----------------------------------------------------------------------------
# Pure-JAX reference (PyTorch semantics) for correctness checking.
# -----------------------------------------------------------------------------
def _lstm_ref(x, w_ih, w_hh, b_ih, b_hh):
    B, _, _ = x.shape
    H = w_hh.shape[1]

    def step(carry, x_t):
        h, c = carry
        g = x_t @ w_ih.T + h @ w_hh.T + b_ih + b_hh
        i, f, gg, o = jnp.split(g, 4, axis=-1)
        i, f, o = jax.nn.sigmoid(i), jax.nn.sigmoid(f), jax.nn.sigmoid(o)
        gg = jnp.tanh(gg)
        c = f * c + i * gg
        h = o * jnp.tanh(c)
        return (h, c), None

    init = (jnp.zeros((B, H), jnp.float32), jnp.zeros((B, H), jnp.float32))
    (h, _), _ = jax.lax.scan(step, init, jnp.transpose(x, (1, 0, 2)))
    return h


def _forward_ref(p, table_embeddings, statement_embeddings):
    th = _lstm_ref(table_embeddings, p["t_w_ih"], p["t_w_hh"],
                   p["t_b_ih"], p["t_b_hh"])
    sh = _lstm_ref(statement_embeddings, p["s_w_ih"], p["s_w_hh"],
                   p["s_b_ih"], p["s_b_hh"])
    combined = jnp.concatenate([th, sh], axis=1)
    x = jnp.maximum(combined @ p["fc1_w"].T + p["fc1_b"], 0.0)
    return x @ p["fc2_w"].T + p["fc2_b"]


if __name__ == "__main__":
    batch = 2
    table_seq_len = 8
    statement_seq_len = 6
    embedding_dim = 16
    hidden_dim = 32

    key = jax.random.PRNGKey(0)
    k_params, k_tab, k_stmt = jax.random.split(key, 3)

    torch_params = init_torch_params(k_params, embedding_dim, hidden_dim)
    kernel_params = prepare_kernel_params(torch_params)

    table_embeddings = jax.random.normal(
        k_tab, (batch, table_seq_len, embedding_dim), jnp.float32)
    statement_embeddings = jax.random.normal(
        k_stmt, (batch, statement_seq_len, embedding_dim), jnp.float32)

    out = table_statement_rnn_forward(kernel_params, table_embeddings,
                                      statement_embeddings)
    out = jax.block_until_ready(out)

    ref = _forward_ref(torch_params, table_embeddings, statement_embeddings)
    tol = 2e-2 if MATMUL_DTYPE == jnp.bfloat16 else 1e-5
    np.testing.assert_allclose(np.asarray(out), np.asarray(ref),
                               rtol=tol, atol=tol)
    assert out.shape == (batch, 1)

    print("KERNEL_OK")
</pallas_src>

<mosaic_0001>
module attributes {stable_mosaic.version = 11 : i64} {
  func.func @_fused_kernel(%arg0: i32, %arg1: memref<1x64x16xbf16, #tpu.memory_space<vmem>>, %arg2: memref<1x48x16xbf16, #tpu.memory_space<vmem>>, %arg3: memref<16x128xbf16, #tpu.memory_space<vmem>>, %arg4: memref<16x128xbf16, #tpu.memory_space<vmem>>, %arg5: memref<1x128xf32, #tpu.memory_space<vmem>>, %arg6: memref<1x128xf32, #tpu.memory_space<vmem>>, %arg7: memref<64x256xbf16, #tpu.memory_space<vmem>>, %arg8: memref<64x32xbf16, #tpu.memory_space<vmem>>, %arg9: memref<1x32xf32, #tpu.memory_space<vmem>>, %arg10: memref<1x32xf32, #tpu.memory_space<vmem>>, %arg11: memref<1x1xf32, #tpu.memory_space<vmem>>, %arg12: memref<8x1xf32, #tpu.memory_space<vmem>>, %arg13: memref<64x128xf32, #tpu.memory_space<vmem>>, %arg14: memref<48x128xf32, #tpu.memory_space<vmem>>) attributes {dimension_semantics = [#tpu.dimension_semantics<parallel>], iteration_bounds = array<i64: 1>, scalar_prefetch = 0 : i64, scratch_operands = 2 : i64, tpu.core_type = #tpu.core_type<tc>, window_params = [{transform_indices = @transform_0, window_bounds = array<i64: 1, 64, 16>}, {transform_indices = @transform_1, window_bounds = array<i64: 1, 48, 16>}, {pipeline_mode = #tpu.pipeline_mode<synchronous>, transform_indices = @transform_2, window_bounds = array<i64: 16, 128>}, {pipeline_mode = #tpu.pipeline_mode<synchronous>, transform_indices = @transform_3, window_bounds = array<i64: 16, 128>}, {pipeline_mode = #tpu.pipeline_mode<synchronous>, transform_indices = @transform_4, window_bounds = array<i64: 1, 128>}, {pipeline_mode = #tpu.pipeline_mode<synchronous>, transform_indices = @transform_5, window_bounds = array<i64: 1, 128>}, {pipeline_mode = #tpu.pipeline_mode<synchronous>, transform_indices = @transform_6, window_bounds = array<i64: 64, 256>}, {pipeline_mode = #tpu.pipeline_mode<synchronous>, transform_indices = @transform_7, window_bounds = array<i64: 64, 32>}, {pipeline_mode = #tpu.pipeline_mode<synchronous>, transform_indices = @transform_8, window_bounds = array<i64: 1, 32>}, {pipeline_mode = #tpu.pipeline_mode<synchronous>, transform_indices = @transform_9, window_bounds = array<i64: 1, 32>}, {pipeline_mode = #tpu.pipeline_mode<synchronous>, transform_indices = @transform_10, window_bounds = array<i64: 1, 1>}, {transform_indices = @transform_11, window_bounds = array<i64: 8, 1>}]} {
    %c0 = arith.constant 0 : index
    %c0_0 = arith.constant 0 : index
    %c0_1 = arith.constant 0 : index
    %0 = vector.load %arg1[%c0, %c0_0, %c0_1] : memref<1x64x16xbf16, #tpu.memory_space<vmem>>, vector<1x64x16xbf16>
    %1 = vector.shape_cast %0 : vector<1x64x16xbf16> to vector<64x16xbf16>
    %c0_2 = arith.constant 0 : index
    %c0_3 = arith.constant 0 : index
    %2 = vector.load %arg3[%c0_2, %c0_3] : memref<16x128xbf16, #tpu.memory_space<vmem>>, vector<16x128xbf16>
    %cst = arith.constant dense<0.000000e+00> : vector<64x128xf32>
    %3 = tpu.matmul %1, %2, %cst {dimension_numbers = #tpu.dot_dimension_numbers<[1], [0], [0], [1], [0, 0, 1, 1], [], []>} : vector<64x16xbf16>, vector<16x128xbf16>, vector<64x128xf32> -> vector<64x128xf32>
    %c0_4 = arith.constant 0 : index
    %c0_5 = arith.constant 0 : index
    %4 = vector.load %arg5[%c0_4, %c0_5] : memref<1x128xf32, #tpu.memory_space<vmem>>, vector<1x128xf32>
    %5 = vector.broadcast %4 : vector<1x128xf32> to vector<64x128xf32>
    %6 = arith.addf %3, %5 : vector<64x128xf32>
    %c0_6 = arith.constant 0 : index
    %c0_7 = arith.constant 0 : index
    %7 = vector.load %arg13[%c0_6, %c0_7] : memref<64x128xf32, #tpu.memory_space<vmem>>, vector<64x128xf32>
    tpu.vector_store %arg13[%c0_6, %c0_7], %6 {strides = array<i32>} : memref<64x128xf32, #tpu.memory_space<vmem>>, vector<64x128xf32>,
    %c0_8 = arith.constant 0 : index
    %c0_9 = arith.constant 0 : index
    %c0_10 = arith.constant 0 : index
    %8 = vector.load %arg2[%c0_8, %c0_9, %c0_10] : memref<1x48x16xbf16, #tpu.memory_space<vmem>>, vector<1x48x16xbf16>
    %9 = vector.shape_cast %8 : vector<1x48x16xbf16> to vector<48x16xbf16>
    %c0_11 = arith.constant 0 : index
    %c0_12 = arith.constant 0 : index
    %10 = vector.load %arg4[%c0_11, %c0_12] : memref<16x128xbf16, #tpu.memory_space<vmem>>, vector<16x128xbf16>
    %cst_13 = arith.constant dense<0.000000e+00> : vector<48x128xf32>
    %11 = tpu.matmul %9, %10, %cst_13 {dimension_numbers = #tpu.dot_dimension_numbers<[1], [0], [0], [1], [0, 0, 1, 1], [], []>} : vector<48x16xbf16>, vector<16x128xbf16>, vector<48x128xf32> -> vector<48x128xf32>
    %c0_14 = arith.constant 0 : index
    %c0_15 = arith.constant 0 : index
    %12 = vector.load %arg6[%c0_14, %c0_15] : memref<1x128xf32, #tpu.memory_space<vmem>>, vector<1x128xf32>
    %13 = vector.broadcast %12 : vector<1x128xf32> to vector<48x128xf32>
    %14 = arith.addf %11, %13 : vector<48x128xf32>
    %c0_16 = arith.constant 0 : index
    %c0_17 = arith.constant 0 : index
    %15 = vector.load %arg14[%c0_16, %c0_17] : memref<48x128xf32, #tpu.memory_space<vmem>>, vector<48x128xf32>
    tpu.vector_store %arg14[%c0_16, %c0_17], %14 {strides = array<i32>} : memref<48x128xf32, #tpu.memory_space<vmem>>, vector<48x128xf32>,
    %c0_18 = arith.constant 0 : index
    %c0_19 = arith.constant 0 : index
    %16 = vector.load %arg7[%c0_18, %c0_19] : memref<64x256xbf16, #tpu.memory_space<vmem>>, vector<64x256xbf16>
    %cst_20 = arith.constant 0.000000e+00 : f32
    %17 = vector.broadcast %cst_20 : f32 to vector<8x32xf32>
    %c0_i32 = arith.constant 0 : i32
    %18 = tpu.concatenate %17, %17 in 1 : vector<8x32xf32>, vector<8x32xf32> -> vector<8x64xf32>
    %19 = arith.truncf %18 : vector<8x64xf32> to vector<8x64xbf16>
    %cst_21 = arith.constant dense<0.000000e+00> : vector<8x256xf32>
    %20 = tpu.matmul %19, %16, %cst_21 {dimension_numbers = #tpu.dot_dimension_numbers<[1], [0], [0], [1], [0, 0, 1, 1], [], []>} : vector<8x64xbf16>, vector<64x256xbf16>, vector<8x256xf32> -> vector<8x256xf32>
    %c8_i32 = arith.constant 8 : i32
    %21 = arith.muli %c0_i32, %c8_i32 : i32
    %22 = tpu.assume_multiple %21, 8 : i32
    %23 = arith.index_cast %22 : i32 to index
    %c0_22 = arith.constant 0 : index
    %24 = vector.load %arg13[%23, %c0_22] : memref<64x128xf32, #tpu.memory_space<vmem>>, vector<8x128xf32>
    %c5_i32 = arith.constant 5 : i32
    %25 = arith.minsi %c0_i32, %c5_i32 : i32
    %c8_i32_23 = arith.constant 8 : i32
    %26 = arith.muli %25, %c8_i32_23 : i32
    %27 = tpu.assume_multiple %26, 8 : i32
    %28 = arith.index_cast %27 : i32 to index
    %c0_24 = arith.constant 0 : index
    %29 = vector.load %arg14[%28, %c0_24] : memref<48x128xf32, #tpu.memory_space<vmem>>, vector<8x128xf32>
    %30 = tpu.concatenate %24, %29 in 1 : vector<8x128xf32>, vector<8x128xf32> -> vector<8x256xf32>
    %31 = arith.addf %30, %20 : vector<8x256xf32>
    %32 = vector.extract_strided_slice %31 {offsets = [0, 0], sizes = [8, 32], strides = [1, 1]} : vector<8x256xf32> to vector<8x32xf32>
    %33 = math.tanh %32 : vector<8x32xf32>
    %34 = vector.extract_strided_slice %31 {offsets = [0, 32], sizes = [8, 192], strides = [1, 1]} : vector<8x256xf32> to vector<8x192xf32>
    %35 = arith.negf %34 : vector<8x192xf32>
    %36 = math.exp %35 : vector<8x192xf32>
    %cst_25 = arith.constant 1.000000e+00 : f32
    %37 = vector.broadcast %cst_25 : f32 to vector<8x192xf32>
    %38 = arith.addf %37, %36 : vector<8x192xf32>
    %39 = arith.divf %37, %38 : vector<8x192xf32>
    %40 = vector.extract_strided_slice %31 {offsets = [0, 224], sizes = [8, 32], strides = [1, 1]} : vector<8x256xf32> to vector<8x32xf32>
    %41 = math.tanh %40 : vector<8x32xf32>
    %42 = vector.extract_strided_slice %39 {offsets = [0, 0], sizes = [8, 32], strides = [1, 1]} : vector<8x192xf32> to vector<8x32xf32>
    %43 = vector.extract_strided_slice %39 {offsets = [0, 32], sizes = [8, 32], strides = [1, 1]} : vector<8x192xf32> to vector<8x32xf32>
    %44 = vector.extract_strided_slice %39 {offsets = [0, 64], sizes = [8, 32], strides = [1, 1]} : vector<8x192xf32> to vector<8x32xf32>
    %45 = vector.extract_strided_slice %39 {offsets = [0, 96], sizes = [8, 32], strides = [1, 1]} : vector<8x192xf32> to vector<8x32xf32>
    %46 = vector.extract_strided_slice %39 {offsets = [0, 128], sizes = [8, 32], strides = [1, 1]} : vector<8x192xf32> to vector<8x32xf32>
    %47 = vector.extract_strided_slice %39 {offsets = [0, 160], sizes = [8, 32], strides = [1, 1]} : vector<8x192xf32> to vector<8x32xf32>
    %48 = arith.mulf %43, %17 : vector<8x32xf32>
    %49 = arith.mulf %42, %33 : vector<8x32xf32>
    %50 = arith.addf %48, %49 : vector<8x32xf32>
    %51 = arith.mulf %46, %17 : vector<8x32xf32>
    %52 = arith.mulf %45, %41 : vector<8x32xf32>
    %53 = arith.addf %51, %52 : vector<8x32xf32>
    %54 = math.tanh %50 : vector<8x32xf32>
    %55 = arith.mulf %44, %54 : vector<8x32xf32>
    %56 = math.tanh %53 : vector<8x32xf32>
    %57 = arith.mulf %47, %56 : vector<8x32xf32>
    %c6_i32 = arith.constant 6 : i32
    %58 = arith.cmpi slt, %c0_i32, %c6_i32 : i32
    %59 = arith.select %58, %57, %17 : vector<8x32xf32>
    %60 = arith.select %58, %53, %17 : vector<8x32xf32>
    %c1_i32 = arith.constant 1 : i32
    %61 = tpu.concatenate %55, %59 in 1 : vector<8x32xf32>, vector<8x32xf32> -> vector<8x64xf32>
    %62 = arith.truncf %61 : vector<8x64xf32> to vector<8x64xbf16>
    %cst_26 = arith.constant dense<0.000000e+00> : vector<8x256xf32>
    %63 = tpu.matmul %62, %16, %cst_26 {dimension_numbers = #tpu.dot_dimension_numbers<[1], [0], [0], [1], [0, 0, 1, 1], [], []>} : vector<8x64xbf16>, vector<64x256xbf16>, vector<8x256xf32> -> vector<8x256xf32>
    %c8_i32_27 = arith.constant 8 : i32
    %64 = arith.muli %c1_i32, %c8_i32_27 : i32
    %65 = tpu.assume_multiple %64, 8 : i32
    %66 = arith.index_cast %65 : i32 to index
    %c0_28 = arith.constant 0 : index
    %67 = vector.load %arg13[%66, %c0_28] : memref<64x128xf32, #tpu.memory_space<vmem>>, vector<8x128xf32>
    %c5_i32_29 = arith.constant 5 : i32
    %68 = arith.minsi %c1_i32, %c5_i32_29 : i32
    %c8_i32_30 = arith.constant 8 : i32
    %69 = arith.muli %68, %c8_i32_30 : i32
    %70 = tpu.assume_multiple %69, 8 : i32
    %71 = arith.index_cast %70 : i32 to index
    %c0_31 = arith.constant 0 : index
    %72 = vector.load %arg14[%71, %c0_31] : memref<48x128xf32, #tpu.memory_space<vmem>>, vector<8x128xf32>
    %73 = tpu.concatenate %67, %72 in 1 : vector<8x128xf32>, vector<8x128xf32> -> vector<8x256xf32>
    %74 = arith.addf %73, %63 : vector<8x256xf32>
    %75 = vector.extract_strided_slice %74 {offsets = [0, 0], sizes = [8, 32], strides = [1, 1]} : vector<8x256xf32> to vector<8x32xf32>
    %76 = math.tanh %75 : vector<8x32xf32>
    %77 = vector.extract_strided_slice %74 {offsets = [0, 32], sizes = [8, 192], strides = [1, 1]} : vector<8x256xf32> to vector<8x192xf32>
    %78 = arith.negf %77 : vector<8x192xf32>
    %79 = math.exp %78 : vector<8x192xf32>
    %cst_32 = arith.constant 1.000000e+00 : f32
    %80 = vector.broadcast %cst_32 : f32 to vector<8x192xf32>
    %81 = arith.addf %80, %79 : vector<8x192xf32>
    %82 = arith.divf %80, %81 : vector<8x192xf32>
    %83 = vector.extract_strided_slice %74 {offsets = [0, 224], sizes = [8, 32], strides = [1, 1]} : vector<8x256xf32> to vector<8x32xf32>
    %84 = math.tanh %83 : vector<8x32xf32>
    %85 = vector.extract_strided_slice %82 {offsets = [0, 0], sizes = [8, 32], strides = [1, 1]} : vector<8x192xf32> to vector<8x32xf32>
    %86 = vector.extract_strided_slice %82 {offsets = [0, 32], sizes = [8, 32], strides = [1, 1]} : vector<8x192xf32> to vector<8x32xf32>
    %87 = vector.extract_strided_slice %82 {offsets = [0, 64], sizes = [8, 32], strides = [1, 1]} : vector<8x192xf32> to vector<8x32xf32>
    %88 = vector.extract_strided_slice %82 {offsets = [0, 96], sizes = [8, 32], strides = [1, 1]} : vector<8x192xf32> to vector<8x32xf32>
    %89 = vector.extract_strided_slice %82 {offsets = [0, 128], sizes = [8, 32], strides = [1, 1]} : vector<8x192xf32> to vector<8x32xf32>
    %90 = vector.extract_strided_slice %82 {offsets = [0, 160], sizes = [8, 32], strides = [1, 1]} : vector<8x192xf32> to vector<8x32xf32>
    %91 = arith.mulf %86, %50 : vector<8x32xf32>
    %92 = arith.mulf %85, %76 : vector<8x32xf32>
    %93 = arith.addf %91, %92 : vector<8x32xf32>
    %94 = arith.mulf %89, %60 : vector<8x32xf32>
    %95 = arith.mulf %88, %84 : vector<8x32xf32>
    %96 = arith.addf %94, %95 : vector<8x32xf32>
    %97 = math.tanh %93 : vector<8x32xf32>
    %98 = arith.mulf %87, %97 : vector<8x32xf32>
    %99 = math.tanh %96 : vector<8x32xf32>
    %100 = arith.mulf %90, %99 : vector<8x32xf32>
    %c6_i32_33 = arith.constant 6 : i32
    %101 = arith.cmpi slt, %c1_i32, %c6_i32_33 : i32
    %102 = arith.select %101, %100, %59 : vector<8x32xf32>
    %103 = arith.select %101, %96, %60 : vector<8x32xf32>
    %c2_i32 = arith.constant 2 : i32
    %104 = tpu.concatenate %98, %102 in 1 : vector<8x32xf32>, vector<8x32xf32> -> vector<8x64xf32>
    %105 = arith.truncf %104 : vector<8x64xf32> to vector<8x64xbf16>
    %cst_34 = arith.constant dense<0.000000e+00> : vector<8x256xf32>
    %106 = tpu.matmul %105, %16, %cst_34 {dimension_numbers = #tpu.dot_dimension_numbers<[1], [0], [0], [1], [0, 0, 1, 1], [], []>} : vector<8x64xbf16>, vector<64x256xbf16>, vector<8x256xf32> -> vector<8x256xf32>
    %c8_i32_35 = arith.constant 8 : i32
    %107 = arith.muli %c2_i32, %c8_i32_35 : i32
    %108 = tpu.assume_multiple %107, 8 : i32
    %109 = arith.index_cast %108 : i32 to index
    %c0_36 = arith.constant 0 : index
    %110 = vector.load %arg13[%109, %c0_36] : memref<64x128xf32, #tpu.memory_space<vmem>>, vector<8x128xf32>
    %c5_i32_37 = arith.constant 5 : i32
    %111 = arith.minsi %c2_i32, %c5_i32_37 : i32
    %c8_i32_38 = arith.constant 8 : i32
    %112 = arith.muli %111, %c8_i32_38 : i32
    %113 = tpu.assume_multiple %112, 8 : i32
    %114 = arith.index_cast %113 : i32 to index
    %c0_39 = arith.constant 0 : index
    %115 = vector.load %arg14[%114, %c0_39] : memref<48x128xf32, #tpu.memory_space<vmem>>, vector<8x128xf32>
    %116 = tpu.concatenate %110, %115 in 1 : vector<8x128xf32>, vector<8x128xf32> -> vector<8x256xf32>
    %117 = arith.addf %116, %106 : vector<8x256xf32>
    %118 = vector.extract_strided_slice %117 {offsets = [0, 0], sizes = [8, 32], strides = [1, 1]} : vector<8x256xf32> to vector<8x32xf32>
    %119 = math.tanh %118 : vector<8x32xf32>
    %120 = vector.extract_strided_slice %117 {offsets = [0, 32], sizes = [8, 192], strides = [1, 1]} : vector<8x256xf32> to vector<8x192xf32>
    %121 = arith.negf %120 : vector<8x192xf32>
    %122 = math.exp %121 : vector<8x192xf32>
    %cst_40 = arith.constant 1.000000e+00 : f32
    %123 = vector.broadcast %cst_40 : f32 to vector<8x192xf32>
    %124 = arith.addf %123, %122 : vector<8x192xf32>
    %125 = arith.divf %123, %124 : vector<8x192xf32>
    %126 = vector.extract_strided_slice %117 {offsets = [0, 224], sizes = [8, 32], strides = [1, 1]} : vector<8x256xf32> to vector<8x32xf32>
    %127 = math.tanh %126 : vector<8x32xf32>
    %128 = vector.extract_strided_slice %125 {offsets = [0, 0], sizes = [8, 32], strides = [1, 1]} : vector<8x192xf32> to vector<8x32xf32>
    %129 = vector.extract_strided_slice %125 {offsets = [0, 32], sizes = [8, 32], strides = [1, 1]} : vector<8x192xf32> to vector<8x32xf32>
    %130 = vector.extract_strided_slice %125 {offsets = [0, 64], sizes = [8, 32], strides = [1, 1]} : vector<8x192xf32> to vector<8x32xf32>
    %131 = vector.extract_strided_slice %125 {offsets = [0, 96], sizes = [8, 32], strides = [1, 1]} : vector<8x192xf32> to vector<8x32xf32>
    %132 = vector.extract_strided_slice %125 {offsets = [0, 128], sizes = [8, 32], strides = [1, 1]} : vector<8x192xf32> to vector<8x32xf32>
    %133 = vector.extract_strided_slice %125 {offsets = [0, 160], sizes = [8, 32], strides = [1, 1]} : vector<8x192xf32> to vector<8x32xf32>
    %134 = arith.mulf %129, %93 : vector<8x32xf32>
    %135 = arith.mulf %128, %119 : vector<8x32xf32>
    %136 = arith.addf %134, %135 : vector<8x32xf32>
    %137 = arith.mulf %132, %103 : vector<8x32xf32>
    %138 = arith.mulf %131, %127 : vector<8x32xf32>
    %139 = arith.addf %137, %138 : vector<8x32xf32>
    %140 = math.tanh %136 : vector<8x32xf32>
    %141 = arith.mulf %130, %140 : vector<8x32xf32>
    %142 = math.tanh %139 : vector<8x32xf32>
    %143 = arith.mulf %133, %142 : vector<8x32xf32>
    %c6_i32_41 = arith.constant 6 : i32
    %144 = arith.cmpi slt, %c2_i32, %c6_i32_41 : i32
    %145 = arith.select %144, %143, %102 : vector<8x32xf32>
    %146 = arith.select %144, %139, %103 : vector<8x32xf32>
    %c3_i32 = arith.constant 3 : i32
    %147 = tpu.concatenate %141, %145 in 1 : vector<8x32xf32>, vector<8x32xf32> -> vector<8x64xf32>
    %148 = arith.truncf %147 : vector<8x64xf32> to vector<8x64xbf16>
    %cst_42 = arith.constant dense<0.000000e+00> : vector<8x256xf32>
    %149 = tpu.matmul %148, %16, %cst_42 {dimension_numbers = #tpu.dot_dimension_numbers<[1], [0], [0], [1], [0, 0, 1, 1], [], []>} : vector<8x64xbf16>, vector<64x256xbf16>, vector<8x256xf32> -> vector<8x256xf32>
    %c8_i32_43 = arith.constant 8 : i32
    %150 = arith.muli %c3_i32, %c8_i32_43 : i32
    %151 = tpu.assume_multiple %150, 8 : i32
    %152 = arith.index_cast %151 : i32 to index
    %c0_44 = arith.constant 0 : index
    %153 = vector.load %arg13[%152, %c0_44] : memref<64x128xf32, #tpu.memory_space<vmem>>, vector<8x128xf32>
    %c5_i32_45 = arith.constant 5 : i32
    %154 = arith.minsi %c3_i32, %c5_i32_45 : i32
    %c8_i32_46 = arith.constant 8 : i32
    %155 = arith.muli %154, %c8_i32_46 : i32
    %156 = tpu.assume_multiple %155, 8 : i32
    %157 = arith.index_cast %156 : i32 to index
    %c0_47 = arith.constant 0 : index
    %158 = vector.load %arg14[%157, %c0_47] : memref<48x128xf32, #tpu.memory_space<vmem>>, vector<8x128xf32>
    %159 = tpu.concatenate %153, %158 in 1 : vector<8x128xf32>, vector<8x128xf32> -> vector<8x256xf32>
    %160 = arith.addf %159, %149 : vector<8x256xf32>
    %161 = vector.extract_strided_slice %160 {offsets = [0, 0], sizes = [8, 32], strides = [1, 1]} : vector<8x256xf32> to vector<8x32xf32>
    %162 = math.tanh %161 : vector<8x32xf32>
    %163 = vector.extract_strided_slice %160 {offsets = [0, 32], sizes = [8, 192], strides = [1, 1]} : vector<8x256xf32> to vector<8x192xf32>
    %164 = arith.negf %163 : vector<8x192xf32>
    %165 = math.exp %164 : vector<8x192xf32>
    %cst_48 = arith.constant 1.000000e+00 : f32
    %166 = vector.broadcast %cst_48 : f32 to vector<8x192xf32>
    %167 = arith.addf %166, %165 : vector<8x192xf32>
    %168 = arith.divf %166, %167 : vector<8x192xf32>
    %169 = vector.extract_strided_slice %160 {offsets = [0, 224], sizes = [8, 32], strides = [1, 1]} : vector<8x256xf32> to vector<8x32xf32>
    %170 = math.tanh %169 : vector<8x32xf32>
    %171 = vector.extract_strided_slice %168 {offsets = [0, 0], sizes = [8, 32], strides = [1, 1]} : vector<8x192xf32> to vector<8x32xf32>
    %172 = vector.extract_strided_slice %168 {offsets = [0, 32], sizes = [8, 32], strides = [1, 1]} : vector<8x192xf32> to vector<8x32xf32>
    %173 = vector.extract_strided_slice %168 {offsets = [0, 64], sizes = [8, 32], strides = [1, 1]} : vector<8x192xf32> to vector<8x32xf32>
    %174 = vector.extract_strided_slice %168 {offsets = [0, 96], sizes = [8, 32], strides = [1, 1]} : vector<8x192xf32> to vector<8x32xf32>
    %175 = vector.extract_strided_slice %168 {offsets = [0, 128], sizes = [8, 32], strides = [1, 1]} : vector<8x192xf32> to vector<8x32xf32>
    %176 = vector.extract_strided_slice %168 {offsets = [0, 160], sizes = [8, 32], strides = [1, 1]} : vector<8x192xf32> to vector<8x32xf32>
    %177 = arith.mulf %172, %136 : vector<8x32xf32>
    %178 = arith.mulf %171, %162 : vector<8x32xf32>
    %179 = arith.addf %177, %178 : vector<8x32xf32>
    %180 = arith.mulf %175, %146 : vector<8x32xf32>
    %181 = arith.mulf %174, %170 : vector<8x32xf32>
    %182 = arith.addf %180, %181 : vector<8x32xf32>
    %183 = math.tanh %179 : vector<8x32xf32>
    %184 = arith.mulf %173, %183 : vector<8x32xf32>
    %185 = math.tanh %182 : vector<8x32xf32>
    %186 = arith.mulf %176, %185 : vector<8x32xf32>
    %c6_i32_49 = arith.constant 6 : i32
    %187 = arith.cmpi slt, %c3_i32, %c6_i32_49 : i32
    %188 = arith.select %187, %186, %145 : vector<8x32xf32>
    %189 = arith.select %187, %182, %146 : vector<8x32xf32>
    %c4_i32 = arith.constant 4 : i32
    %190 = tpu.concatenate %184, %188 in 1 : vector<8x32xf32>, vector<8x32xf32> -> vector<8x64xf32>
    %191 = arith.truncf %190 : vector<8x64xf32> to vector<8x64xbf16>
    %cst_50 = arith.constant dense<0.000000e+00> : vector<8x256xf32>
    %192 = tpu.matmul %191, %16, %cst_50 {dimension_numbers = #tpu.dot_dimension_numbers<[1], [0], [0], [1], [0, 0, 1, 1], [], []>} : vector<8x64xbf16>, vector<64x256xbf16>, vector<8x256xf32> -> vector<8x256xf32>
    %c8_i32_51 = arith.constant 8 : i32
    %193 = arith.muli %c4_i32, %c8_i32_51 : i32
    %194 = tpu.assume_multiple %193, 8 : i32
    %195 = arith.index_cast %194 : i32 to index
    %c0_52 = arith.constant 0 : index
    %196 = vector.load %arg13[%195, %c0_52] : memref<64x128xf32, #tpu.memory_space<vmem>>, vector<8x128xf32>
    %c5_i32_53 = arith.constant 5 : i32
    %197 = arith.minsi %c4_i32, %c5_i32_53 : i32
    %c8_i32_54 = arith.constant 8 : i32
    %198 = arith.muli %197, %c8_i32_54 : i32
    %199 = tpu.assume_multiple %198, 8 : i32
    %200 = arith.index_cast %199 : i32 to index
    %c0_55 = arith.constant 0 : index
    %201 = vector.load %arg14[%200, %c0_55] : memref<48x128xf32, #tpu.memory_space<vmem>>, vector<8x128xf32>
    %202 = tpu.concatenate %196, %201 in 1 : vector<8x128xf32>, vector<8x128xf32> -> vector<8x256xf32>
    %203 = arith.addf %202, %192 : vector<8x256xf32>
    %204 = vector.extract_strided_slice %203 {offsets = [0, 0], sizes = [8, 32], strides = [1, 1]} : vector<8x256xf32> to vector<8x32xf32>
    %205 = math.tanh %204 : vector<8x32xf32>
    %206 = vector.extract_strided_slice %203 {offsets = [0, 32], sizes = [8, 192], strides = [1, 1]} : vector<8x256xf32> to vector<8x192xf32>
    %207 = arith.negf %206 : vector<8x192xf32>
    %208 = math.exp %207 : vector<8x192xf32>
    %cst_56 = arith.constant 1.000000e+00 : f32
    %209 = vector.broadcast %cst_56 : f32 to vector<8x192xf32>
    %210 = arith.addf %209, %208 : vector<8x192xf32>
    %211 = arith.divf %209, %210 : vector<8x192xf32>
    %212 = vector.extract_strided_slice %203 {offsets = [0, 224], sizes = [8, 32], strides = [1, 1]} : vector<8x256xf32> to vector<8x32xf32>
    %213 = math.tanh %212 : vector<8x32xf32>
    %214 = vector.extract_strided_slice %211 {offsets = [0, 0], sizes = [8, 32], strides = [1, 1]} : vector<8x192xf32> to vector<8x32xf32>
    %215 = vector.extract_strided_slice %211 {offsets = [0, 32], sizes = [8, 32], strides = [1, 1]} : vector<8x192xf32> to vector<8x32xf32>
    %216 = vector.extract_strided_slice %211 {offsets = [0, 64], sizes = [8, 32], strides = [1, 1]} : vector<8x192xf32> to vector<8x32xf32>
    %217 = vector.extract_strided_slice %211 {offsets = [0, 96], sizes = [8, 32], strides = [1, 1]} : vector<8x192xf32> to vector<8x32xf32>
    %218 = vector.extract_strided_slice %211 {offsets = [0, 128], sizes = [8, 32], strides = [1, 1]} : vector<8x192xf32> to vector<8x32xf32>
    %219 = vector.extract_strided_slice %211 {offsets = [0, 160], sizes = [8, 32], strides = [1, 1]} : vector<8x192xf32> to vector<8x32xf32>
    %220 = arith.mulf %215, %179 : vector<8x32xf32>
    %221 = arith.mulf %214, %205 : vector<8x32xf32>
    %222 = arith.addf %220, %221 : vector<8x32xf32>
    %223 = arith.mulf %218, %189 : vector<8x32xf32>
    %224 = arith.mulf %217, %213 : vector<8x32xf32>
    %225 = arith.addf %223, %224 : vector<8x32xf32>
    %226 = math.tanh %222 : vector<8x32xf32>
    %227 = arith.mulf %216, %226 : vector<8x32xf32>
    %228 = math.tanh %225 : vector<8x32xf32>
    %229 = arith.mulf %219, %228 : vector<8x32xf32>
    %c6_i32_57 = arith.constant 6 : i32
    %230 = arith.cmpi slt, %c4_i32, %c6_i32_57 : i32
    %231 = arith.select %230, %229, %188 : vector<8x32xf32>
    %232 = arith.select %230, %225, %189 : vector<8x32xf32>
    %c5_i32_58 = arith.constant 5 : i32
    %233 = tpu.concatenate %227, %231 in 1 : vector<8x32xf32>, vector<8x32xf32> -> vector<8x64xf32>
    %234 = arith.truncf %233 : vector<8x64xf32> to vector<8x64xbf16>
    %cst_59 = arith.constant dense<0.000000e+00> : vector<8x256xf32>
    %235 = tpu.matmul %234, %16, %cst_59 {dimension_numbers = #tpu.dot_dimension_numbers<[1], [0], [0], [1], [0, 0, 1, 1], [], []>} : vector<8x64xbf16>, vector<64x256xbf16>, vector<8x256xf32> -> vector<8x256xf32>
    %c8_i32_60 = arith.constant 8 : i32
    %236 = arith.muli %c5_i32_58, %c8_i32_60 : i32
    %237 = tpu.assume_multiple %236, 8 : i32
    %238 = arith.index_cast %237 : i32 to index
    %c0_61 = arith.constant 0 : index
    %239 = vector.load %arg13[%238, %c0_61] : memref<64x128xf32, #tpu.memory_space<vmem>>, vector<8x128xf32>
    %c5_i32_62 = arith.constant 5 : i32
    %240 = arith.minsi %c5_i32_58, %c5_i32_62 : i32
    %c8_i32_63 = arith.constant 8 : i32
    %241 = arith.muli %240, %c8_i32_63 : i32
    %242 = tpu.assume_multiple %241, 8 : i32
    %243 = arith.index_cast %242 : i32 to index
    %c0_64 = arith.constant 0 : index
    %244 = vector.load %arg14[%243, %c0_64] : memref<48x128xf32, #tpu.memory_space<vmem>>, vector<8x128xf32>
    %245 = tpu.concatenate %239, %244 in 1 : vector<8x128xf32>, vector<8x128xf32> -> vector<8x256xf32>
    %246 = arith.addf %245, %235 : vector<8x256xf32>
    %247 = vector.extract_strided_slice %246 {offsets = [0, 0], sizes = [8, 32], strides = [1, 1]} : vector<8x256xf32> to vector<8x32xf32>
    %248 = math.tanh %247 : vector<8x32xf32>
    %249 = vector.extract_strided_slice %246 {offsets = [0, 32], sizes = [8, 192], strides = [1, 1]} : vector<8x256xf32> to vector<8x192xf32>
    %250 = arith.negf %249 : vector<8x192xf32>
    %251 = math.exp %250 : vector<8x192xf32>
    %cst_65 = arith.constant 1.000000e+00 : f32
    %252 = vector.broadcast %cst_65 : f32 to vector<8x192xf32>
    %253 = arith.addf %252, %251 : vector<8x192xf32>
    %254 = arith.divf %252, %253 : vector<8x192xf32>
    %255 = vector.extract_strided_slice %246 {offsets = [0, 224], sizes = [8, 32], strides = [1, 1]} : vector<8x256xf32> to vector<8x32xf32>
    %256 = math.tanh %255 : vector<8x32xf32>
    %257 = vector.extract_strided_slice %254 {offsets = [0, 0], sizes = [8, 32], strides = [1, 1]} : vector<8x192xf32> to vector<8x32xf32>
    %258 = vector.extract_strided_slice %254 {offsets = [0, 32], sizes = [8, 32], strides = [1, 1]} : vector<8x192xf32> to vector<8x32xf32>
    %259 = vector.extract_strided_slice %254 {offsets = [0, 64], sizes = [8, 32], strides = [1, 1]} : vector<8x192xf32> to vector<8x32xf32>
    %260 = vector.extract_strided_slice %254 {offsets = [0, 96], sizes = [8, 32], strides = [1, 1]} : vector<8x192xf32> to vector<8x32xf32>
    %261 = vector.extract_strided_slice %254 {offsets = [0, 128], sizes = [8, 32], strides = [1, 1]} : vector<8x192xf32> to vector<8x32xf32>
    %262 = vector.extract_strided_slice %254 {offsets = [0, 160], sizes = [8, 32], strides = [1, 1]} : vector<8x192xf32> to vector<8x32xf32>
    %263 = arith.mulf %258, %222 : vector<8x32xf32>
    %264 = arith.mulf %257, %248 : vector<8x32xf32>
    %265 = arith.addf %263, %264 : vector<8x32xf32>
    %266 = arith.mulf %261, %232 : vector<8x32xf32>
    %267 = arith.mulf %260, %256 : vector<8x32xf32>
    %268 = arith.addf %266, %267 : vector<8x32xf32>
    %269 = math.tanh %265 : vector<8x32xf32>
    %270 = arith.mulf %259, %269 : vector<8x32xf32>
    %271 = math.tanh %268 : vector<8x32xf32>
    %272 = arith.mulf %262, %271 : vector<8x32xf32>
    %c6_i32_66 = arith.constant 6 : i32
    %273 = arith.cmpi slt, %c5_i32_58, %c6_i32_66 : i32
    %274 = arith.select %273, %272, %231 : vector<8x32xf32>
    %275 = arith.select %273, %268, %232 : vector<8x32xf32>
    %c6_i32_67 = arith.constant 6 : i32
    %276 = tpu.concatenate %270, %274 in 1 : vector<8x32xf32>, vector<8x32xf32> -> vector<8x64xf32>
    %277 = arith.truncf %276 : vector<8x64xf32> to vector<8x64xbf16>
    %cst_68 = arith.constant dense<0.000000e+00> : vector<8x256xf32>
    %278 = tpu.matmul %277, %16, %cst_68 {dimension_numbers = #tpu.dot_dimension_numbers<[1], [0], [0], [1], [0, 0, 1, 1], [], []>} : vector<8x64xbf16>, vector<64x256xbf16>, vector<8x256xf32> -> vector<8x256xf32>
    %c8_i32_69 = arith.constant 8 : i32
    %279 = arith.muli %c6_i32_67, %c8_i32_69 : i32
    %280 = tpu.assume_multiple %279, 8 : i32
    %281 = arith.index_cast %280 : i32 to index
    %c0_70 = arith.constant 0 : index
    %282 = vector.load %arg13[%281, %c0_70] : memref<64x128xf32, #tpu.memory_space<vmem>>, vector<8x128xf32>
    %c5_i32_71 = arith.constant 5 : i32
    %283 = arith.minsi %c6_i32_67, %c5_i32_71 : i32
    %c8_i32_72 = arith.constant 8 : i32
    %284 = arith.muli %283, %c8_i32_72 : i32
    %285 = tpu.assume_multiple %284, 8 : i32
    %286 = arith.index_cast %285 : i32 to index
    %c0_73 = arith.constant 0 : index
    %287 = vector.load %arg14[%286, %c0_73] : memref<48x128xf32, #tpu.memory_space<vmem>>, vector<8x128xf32>
    %288 = tpu.concatenate %282, %287 in 1 : vector<8x128xf32>, vector<8x128xf32> -> vector<8x256xf32>
    %289 = arith.addf %288, %278 : vector<8x256xf32>
    %290 = vector.extract_strided_slice %289 {offsets = [0, 0], sizes = [8, 32], strides = [1, 1]} : vector<8x256xf32> to vector<8x32xf32>
    %291 = math.tanh %290 : vector<8x32xf32>
    %292 = vector.extract_strided_slice %289 {offsets = [0, 32], sizes = [8, 192], strides = [1, 1]} : vector<8x256xf32> to vector<8x192xf32>
    %293 = arith.negf %292 : vector<8x192xf32>
    %294 = math.exp %293 : vector<8x192xf32>
    %cst_74 = arith.constant 1.000000e+00 : f32
    %295 = vector.broadcast %cst_74 : f32 to vector<8x192xf32>
    %296 = arith.addf %295, %294 : vector<8x192xf32>
    %297 = arith.divf %295, %296 : vector<8x192xf32>
    %298 = vector.extract_strided_slice %289 {offsets = [0, 224], sizes = [8, 32], strides = [1, 1]} : vector<8x256xf32> to vector<8x32xf32>
    %299 = math.tanh %298 : vector<8x32xf32>
    %300 = vector.extract_strided_slice %297 {offsets = [0, 0], sizes = [8, 32], strides = [1, 1]} : vector<8x192xf32> to vector<8x32xf32>
    %301 = vector.extract_strided_slice %297 {offsets = [0, 32], sizes = [8, 32], strides = [1, 1]} : vector<8x192xf32> to vector<8x32xf32>
    %302 = vector.extract_strided_slice %297 {offsets = [0, 64], sizes = [8, 32], strides = [1, 1]} : vector<8x192xf32> to vector<8x32xf32>
    %303 = vector.extract_strided_slice %297 {offsets = [0, 96], sizes = [8, 32], strides = [1, 1]} : vector<8x192xf32> to vector<8x32xf32>
    %304 = vector.extract_strided_slice %297 {offsets = [0, 128], sizes = [8, 32], strides = [1, 1]} : vector<8x192xf32> to vector<8x32xf32>
    %305 = vector.extract_strided_slice %297 {offsets = [0, 160], sizes = [8, 32], strides = [1, 1]} : vector<8x192xf32> to vector<8x32xf32>
    %306 = arith.mulf %301, %265 : vector<8x32xf32>
    %307 = arith.mulf %300, %291 : vector<8x32xf32>
    %308 = arith.addf %306, %307 : vector<8x32xf32>
    %309 = arith.mulf %304, %275 : vector<8x32xf32>
    %310 = arith.mulf %303, %299 : vector<8x32xf32>
    %311 = arith.addf %309, %310 : vector<8x32xf32>
    %312 = math.tanh %308 : vector<8x32xf32>
    %313 = arith.mulf %302, %312 : vector<8x32xf32>
    %314 = math.tanh %311 : vector<8x32xf32>
    %315 = arith.mulf %305, %314 : vector<8x32xf32>
    %c6_i32_75 = arith.constant 6 : i32
    %316 = arith.cmpi slt, %c6_i32_67, %c6_i32_75 : i32
    %317 = arith.select %316, %315, %274 : vector<8x32xf32>
    %318 = arith.select %316, %311, %275 : vector<8x32xf32>
    %c7_i32 = arith.constant 7 : i32
    %319 = tpu.concatenate %313, %317 in 1 : vector<8x32xf32>, vector<8x32xf32> -> vector<8x64xf32>
    %320 = arith.truncf %319 : vector<8x64xf32> to vector<8x64xbf16>
    %cst_76 = arith.constant dense<0.000000e+00> : vector<8x256xf32>
    %321 = tpu.matmul %320, %16, %cst_76 {dimension_numbers = #tpu.dot_dimension_numbers<[1], [0], [0], [1], [0, 0, 1, 1], [], []>} : vector<8x64xbf16>, vector<64x256xbf16>, vector<8x256xf32> -> vector<8x256xf32>
    %c8_i32_77 = arith.constant 8 : i32
    %322 = arith.muli %c7_i32, %c8_i32_77 : i32
    %323 = tpu.assume_multiple %322, 8 : i32
    %324 = arith.index_cast %323 : i32 to index
    %c0_78 = arith.constant 0 : index
    %325 = vector.load %arg13[%324, %c0_78] : memref<64x128xf32, #tpu.memory_space<vmem>>, vector<8x128xf32>
    %c5_i32_79 = arith.constant 5 : i32
    %326 = arith.minsi %c7_i32, %c5_i32_79 : i32
    %c8_i32_80 = arith.constant 8 : i32
    %327 = arith.muli %326, %c8_i32_80 : i32
    %328 = tpu.assume_multiple %327, 8 : i32
    %329 = arith.index_cast %328 : i32 to index
    %c0_81 = arith.constant 0 : index
    %330 = vector.load %arg14[%329, %c0_81] : memref<48x128xf32, #tpu.memory_space<vmem>>, vector<8x128xf32>
    %331 = tpu.concatenate %325, %330 in 1 : vector<8x128xf32>, vector<8x128xf32> -> vector<8x256xf32>
    %332 = arith.addf %331, %321 : vector<8x256xf32>
    %333 = vector.extract_strided_slice %332 {offsets = [0, 0], sizes = [8, 32], strides = [1, 1]} : vector<8x256xf32> to vector<8x32xf32>
    %334 = math.tanh %333 : vector<8x32xf32>
    %335 = vector.extract_strided_slice %332 {offsets = [0, 32], sizes = [8, 192], strides = [1, 1]} : vector<8x256xf32> to vector<8x192xf32>
    %336 = arith.negf %335 : vector<8x192xf32>
    %337 = math.exp %336 : vector<8x192xf32>
    %cst_82 = arith.constant 1.000000e+00 : f32
    %338 = vector.broadcast %cst_82 : f32 to vector<8x192xf32>
    %339 = arith.addf %338, %337 : vector<8x192xf32>
    %340 = arith.divf %338, %339 : vector<8x192xf32>
    %341 = vector.extract_strided_slice %332 {offsets = [0, 224], sizes = [8, 32], strides = [1, 1]} : vector<8x256xf32> to vector<8x32xf32>
    %342 = math.tanh %341 : vector<8x32xf32>
    %343 = vector.extract_strided_slice %340 {offsets = [0, 0], sizes = [8, 32], strides = [1, 1]} : vector<8x192xf32> to vector<8x32xf32>
    %344 = vector.extract_strided_slice %340 {offsets = [0, 32], sizes = [8, 32], strides = [1, 1]} : vector<8x192xf32> to vector<8x32xf32>
    %345 = vector.extract_strided_slice %340 {offsets = [0, 64], sizes = [8, 32], strides = [1, 1]} : vector<8x192xf32> to vector<8x32xf32>
    %346 = vector.extract_strided_slice %340 {offsets = [0, 96], sizes = [8, 32], strides = [1, 1]} : vector<8x192xf32> to vector<8x32xf32>
    %347 = vector.extract_strided_slice %340 {offsets = [0, 128], sizes = [8, 32], strides = [1, 1]} : vector<8x192xf32> to vector<8x32xf32>
    %348 = vector.extract_strided_slice %340 {offsets = [0, 160], sizes = [8, 32], strides = [1, 1]} : vector<8x192xf32> to vector<8x32xf32>
    %349 = arith.mulf %344, %308 : vector<8x32xf32>
    %350 = arith.mulf %343, %334 : vector<8x32xf32>
    %351 = arith.addf %349, %350 : vector<8x32xf32>
    %352 = arith.mulf %347, %318 : vector<8x32xf32>
    %353 = arith.mulf %346, %342 : vector<8x32xf32>
    %354 = arith.addf %352, %353 : vector<8x32xf32>
    %355 = math.tanh %351 : vector<8x32xf32>
    %356 = arith.mulf %345, %355 : vector<8x32xf32>
    %357 = math.tanh %354 : vector<8x32xf32>
    %358 = arith.mulf %348, %357 : vector<8x32xf32>
    %c6_i32_83 = arith.constant 6 : i32
    %359 = arith.cmpi slt, %c7_i32, %c6_i32_83 : i32
    %360 = arith.select %359, %358, %317 : vector<8x32xf32>
    %361 = arith.select %359, %354, %318 : vector<8x32xf32>
    %c8_i32_84 = arith.constant 8 : i32
    %362 = tpu.concatenate %356, %360 in 1 : vector<8x32xf32>, vector<8x32xf32> -> vector<8x64xf32>
    %363 = arith.truncf %362 : vector<8x64xf32> to vector<8x64xbf16>
    %c0_85 = arith.constant 0 : index
    %c0_86 = arith.constant 0 : index
    %364 = vector.load %arg8[%c0_85, %c0_86] : memref<64x32xbf16, #tpu.memory_space<vmem>>, vector<64x32xbf16>
    %cst_87 = arith.constant dense<0.000000e+00> : vector<8x32xf32>
    %365 = tpu.matmul %363, %364, %cst_87 {dimension_numbers = #tpu.dot_dimension_numbers<[1], [0], [0], [1], [0, 0, 1, 1], [], []>} : vector<8x64xbf16>, vector<64x32xbf16>, vector<8x32xf32> -> vector<8x32xf32>
    %c0_88 = arith.constant 0 : index
    %c0_89 = arith.constant 0 : index
    %366 = vector.load %arg9[%c0_88, %c0_89] : memref<1x32xf32, #tpu.memory_space<vmem>>, vector<1x32xf32>
    %367 = vector.broadcast %366 : vector<1x32xf32> to vector<8x32xf32>
    %368 = arith.addf %365, %367 : vector<8x32xf32>
    %cst_90 = arith.constant 0.000000e+00 : f32
    %369 = vector.broadcast %cst_90 : f32 to vector<8x32xf32>
    %370 = arith.maximumf %368, %369 : vector<8x32xf32>
    %c0_91 = arith.constant 0 : index
    %c0_92 = arith.constant 0 : index
    %371 = vector.load %arg10[%c0_91, %c0_92] : memref<1x32xf32, #tpu.memory_space<vmem>>, vector<1x32xf32>
    %372 = vector.broadcast %371 : vector<1x32xf32> to vector<8x32xf32>
    %373 = arith.mulf %370, %372 : vector<8x32xf32>
    %cst_93 = arith.constant dense<0.000000e+00> : vector<8xf32>
    %374 = vector.multi_reduction <add>, %373, %cst_93 [1] : vector<8x32xf32> to vector<8xf32>
    %375 = vector.shape_cast %374 : vector<8xf32> to vector<8x1xf32>
    %c0_94 = arith.constant 0 : index
    %c0_95 = arith.constant 0 : index
    %376 = vector.load %arg11[%c0_94, %c0_95] : memref<1x1xf32, #tpu.memory_space<vmem>>, vector<1x1xf32>
    %377 = vector.broadcast %376 : vector<1x1xf32> to vector<8x1xf32>
    %378 = arith.addf %375, %377 : vector<8x1xf32>
    %c0_96 = arith.constant 0 : index
    %c0_97 = arith.constant 0 : index
    %379 = vector.load %arg12[%c0_96, %c0_97] : memref<8x1xf32, #tpu.memory_space<vmem>>, vector<8x1xf32>
    tpu.vector_store %arg12[%c0_96, %c0_97], %378 {strides = array<i32>} : memref<8x1xf32, #tpu.memory_space<vmem>>, vector<8x1xf32>,
    return
  }
  func.func @transform_0(%arg0: i32) -> (i32, i32, i32) {
    %c0_i32 = arith.constant 0 : i32
    %c0_i32_0 = arith.constant 0 : i32
    %c0_i32_1 = arith.constant 0 : i32
    return %arg0, %c0_i32, %c0_i32_0 : i32, i32, i32
  }
  func.func @transform_1(%arg0: i32) -> (i32, i32, i32) {
    %c0_i32 = arith.constant 0 : i32
    %c0_i32_0 = arith.constant 0 : i32
    %c0_i32_1 = arith.constant 0 : i32
    return %arg0, %c0_i32, %c0_i32_0 : i32, i32, i32
  }
  func.func @transform_2(%arg0: i32) -> (i32, i32) {
    %c0_i32 = arith.constant 0 : i32
    %c0_i32_0 = arith.constant 0 : i32
    %c0_i32_1 = arith.constant 0 : i32
    return %c0_i32, %c0_i32_0 : i32, i32
  }
  func.func @transform_3(%arg0: i32) -> (i32, i32) {
    %c0_i32 = arith.constant 0 : i32
    %c0_i32_0 = arith.constant 0 : i32
    %c0_i32_1 = arith.constant 0 : i32
    return %c0_i32, %c0_i32_0 : i32, i32
  }
  func.func @transform_4(%arg0: i32) -> (i32, i32) {
    %c0_i32 = arith.constant 0 : i32
    %c0_i32_0 = arith.constant 0 : i32
    %c0_i32_1 = arith.constant 0 : i32
    return %c0_i32, %c0_i32_0 : i32, i32
  }
  func.func @transform_5(%arg0: i32) -> (i32, i32) {
    %c0_i32 = arith.constant 0 : i32
    %c0_i32_0 = arith.constant 0 : i32
    %c0_i32_1 = arith.constant 0 : i32
    return %c0_i32, %c0_i32_0 : i32, i32
  }
  func.func @transform_6(%arg0: i32) -> (i32, i32) {
    %c0_i32 = arith.constant 0 : i32
    %c0_i32_0 = arith.constant 0 : i32
    %c0_i32_1 = arith.constant 0 : i32
    return %c0_i32, %c0_i32_0 : i32, i32
  }
  func.func @transform_7(%arg0: i32) -> (i32, i32) {
    %c0_i32 = arith.constant 0 : i32
    %c0_i32_0 = arith.constant 0 : i32
    %c0_i32_1 = arith.constant 0 : i32
    return %c0_i32, %c0_i32_0 : i32, i32
  }
  func.func @transform_8(%arg0: i32) -> (i32, i32) {
    %c0_i32 = arith.constant 0 : i32
    %c0_i32_0 = arith.constant 0 : i32
    %c0_i32_1 = arith.constant 0 : i32
    return %c0_i32, %c0_i32_0 : i32, i32
  }
  func.func @transform_9(%arg0: i32) -> (i32, i32) {
    %c0_i32 = arith.constant 0 : i32
    %c0_i32_0 = arith.constant 0 : i32
    %c0_i32_1 = arith.constant 0 : i32
    return %c0_i32, %c0_i32_0 : i32, i32
  }
  func.func @transform_10(%arg0: i32) -> (i32, i32) {
    %c0_i32 = arith.constant 0 : i32
    %c0_i32_0 = arith.constant 0 : i32
    %c0_i32_1 = arith.constant 0 : i32
    return %c0_i32, %c0_i32_0 : i32, i32
  }
  func.func @transform_11(%arg0: i32) -> (i32, i32) {
    %c0_i32 = arith.constant 0 : i32
    %c0_i32_0 = arith.constant 0 : i32
    return %arg0, %c0_i32 : i32, i32
  }
}

</mosaic_0001>

<bundles_post_ra>
// kernel: tpu_custom_call.1
= control target key start
LH: loop header
LB: loop body
LE: loop exit
PB: predicated region body
PF: predicated region fallthrough
CT: control target
= control target key end

     0   :  { %vm84_vm0 = vcmask 130048   ;;  %v1483_v1 = vmov 0.0   ;;  %vm1484_vm1 = vmmov 0   ;;  %v1485_v16 = vmov 0   ;;  %s1487_s26 = smov 32   ;;  %s1488_s30 = smov 96   ;;  %s1868_s2 = inlined_call_operand.vmem [shape: bf16[16,128], index: 2, kind: input, shape index: {}]   ;;  %s1869_s0 = inlined_call_operand.vmem [shape: bf16[1,64,16], index: 0, kind: input, shape index: {}]   ;;  %s1870_s6 = inlined_call_operand.vmem [shape: bf16[64,256], index: 6, kind: input, shape index: {}]   ;;  %s1871_s3 = inlined_call_operand.vmem [shape: bf16[16,128], index: 3, kind: input, shape index: {}]   ;;  %s1872_s1 = inlined_call_operand.vmem [shape: bf16[1,48,16], index: 1, kind: input, shape index: {}]   ;;  %s1873_s4 = inlined_call_operand.vmem [shape: f32[1,128], index: 4, kind: input, shape index: {}]   ;;  %s1874_s5 = inlined_call_operand.vmem [shape: f32[1,128], index: 5, kind: input, shape index: {}]   ;;  %s1875_s7 = inlined_call_operand.vmem [shape: bf16[64,32], index: 7, kind: input, shape index: {}]   ;;  %s1876_s10 = inlined_call_operand.<no memory space> [shape: f32[1,1], index: 10, kind: input, shape index: {}]   ;;  %s1877_s8 = inlined_call_operand.vmem [shape: f32[1,32], index: 8, kind: input, shape index: {}]   ;;  %s1878_s9 = inlined_call_operand.vmem [shape: f32[1,32], index: 9, kind: input, shape index: {}]   ;;  %s1879_s11 = inlined_call_operand.vmem [shape: f32[8,1], index: 11, kind: output, shape index: {}]  }
   0x1   :  { %v1346_v0 = vld [vmem:[%s1868_s2] sm:$0xff]   ;;  %1314 = vmatprep.subr.bf16.mxu1 %v1483_v1  ;;  %1316 = vmatprep.mubr.msk.bf16.mxu1 %vm1484_vm1, %v1483_v1  ;;  %v1348_v3 = vld [vmem:[%s1869_s0 + $0x8] sm:$0xff]   ;;  %v1576_v6 = vld [vmem:[%s1870_s6 + $0x14] ss:$8 sps:$4 sm:$0xff]   ;;  %v1486_v17 = vmov 0.0|0.0   ;;  %vm432_vm2 = vcmask 261120  }
   0x2   :  { %v1347_v2 = vld [vmem:[%s1869_s0] sm:$0xff]   ;;  %1304 = vmatprep.subr.bf16.mxu0 %v1346_v0  ;;  %v1355_v7 = vld [vmem:[%s1869_s0 + $0x10] sm:$0xff]   ;;  %v1356_v9 = vld [vmem:[%s1869_s0 + $0x18] sm:$0xff]   ;;  %vm327_vm3 = vcmask 523264   ;;  %vm1229_vm4 = vcmask 7168  }
   0x3   :  { %1305 = vmatpush3.bf16.msra.mxu0 %v1346_v0  ;;  %1306 = vmatprep.mubr.msk.bf16.mxu0 %vm84_vm0, %v1347_v2  ;;  %v1565_v4 = vld [vmem:[%s1870_s6 + $0x4] ss:$8 sps:$4 sm:$0xff]   ;;  %v1570_v5 = vld [vmem:[%s1870_s6] ss:$8 sps:$4 sm:$0xff]   ;;  %v1586_v8 = vld [vmem:[%s1870_s6 + $0x10] ss:$8 sps:$4 sm:$0xff]  }
   0x4   :  { %331 = vmatprep.subr.bf16.mxu0 %v1565_v4  ;;  %v1596_v10 = vld [vmem:[%s1870_s6 + $0x24] ss:$8 sps:$4 sm:$0xff]   ;;  %v1604_v12 = vld [vmem:[%s1870_s6 + $0x20] ss:$8 sps:$4 sm:$0xff]   ;;  %v1610_v13 = vld [vmem:[%s1870_s6 + $0x34] ss:$8 sps:$4 sm:$0xff]  }
   0x5   :  { %v1360_v11 = vld [vmem:[%s1871_s3] sm:$0xff]   ;;  %v1623_v15 = vld [vmem:[%s1870_s6 + $0x30] ss:$8 sps:$4 sm:$0xff]  }
   0x6   :  { %1307 = vmatmul.mubr.msk.bf16.vlgmr.msra.gmra.mrb[0].mxu0 %vm84_vm0, %v1348_v3  ;;  %1315 = vmatpush3.bf16.msra.mxu1 %v1360_v11  ;;  %v1364_v14 = vld [vmem:[%s1872_s1] sm:$0xff]   ;;  %v1366_v11 = vld [vmem:[%s1872_s1 + $0x10] sm:$0xff]  }
   0x7   :  { %332 = vmatpush1.bf16.msra.mxu0 %v1570_v5  ;;  %1310 = vmatprep.mubr.msk.bf16.mxu0 %vm84_vm0, %v1355_v7  ;;  %v1235_v18 = vld [vmem:[%s1873_s4] ss:$0 sm:$0xff]  ;;  %v1365_v7 = vld [vmem:[%s1872_s1 + $0x8] sm:$0xff]  }
   0x8   :  { %333 = vmatprep.subr.bf16.mxu0 %v1576_v6  ;;  %438 = vmatprep.subr.bf16.mxu1 %v1565_v4  ;;  %v1668_v36 = vld [vmem:[%s1874_s5] ss:$0 sm:$0xff] }
   0x9   :  { %1317 = vmatmul.mubr.msk.bf16.vlgmr.msra.gmra.mrb[0].mxu1 %vm84_vm0, %v1364_v14 }
   0xa   :  { %439 = vmatpush1.bf16.msra.mxu1 %v1570_v5  ;;  %1320 = vmatprep.mubr.msk.bf16.mxu1 %vm1484_vm1, %v1483_v1 }
   0xb   :  { %334 = vmatpush1.bf16.msra.mxu0 %v1586_v8  ;;  %440 = vmatprep.subr.bf16.mxu1 %v1576_v6 }
   0xc   :  { %335 = vmatprep.subr.bf16.mxu0 %v1596_v10 }
   0xe   :  { %1311 = vmatmul.mubr.msk.bf16.gmra.mrb[4].mxu0 %vm84_vm0, %v1356_v9  ;;  %441 = vmatpush1.bf16.msra.mxu1 %v1586_v8 }
   0xf   :  { %336 = vmatpush1.bf16.msra.mxu0 %v1604_v12  ;;  %363 = vmatprep.mubr.bf16.mxu0 %v1485_v16 }
  0x10   :  { %337 = vmatprep.subr.bf16.mxu0 %v1610_v13  ;;  %442 = vmatprep.subr.bf16.mxu1 %v1596_v10 }
  0x11   :  { %1321 = vmatmul.mubr.msk.bf16.gmra.mrb[4].mxu1 %vm84_vm0, %v1365_v7 }
  0x12   :  { %443 = vmatpush1.bf16.msra.mxu1 %v1604_v12  ;;  %1324 = vmatprep.mubr.msk.bf16.mxu1 %vm1484_vm1, %v1483_v1 }
  0x13   :  { %338 = vmatpush1.bf16.msra.mxu0 %v1623_v15  ;;  %444 = vmatprep.subr.bf16.mxu1 %v1610_v13 }
  0x14   :  { %546 = vmatprep.subr.bf16.mxu0 %v1565_v4 }
  0x16   :  { %364 = vmatmul.mubr.bf16.vlgmr.msra.gmra.mrb[8].mxu0 %v1486_v17  ;;  %445 = vmatpush1.bf16.msra.mxu1 %v1623_v15 }
  0x17   :  { %547 = vmatpush1.bf16.msra.mxu0 %v1570_v5  ;;  %578 = vmatprep.mubr.bf16.mxu0 %v1485_v16 }
  0x18   :  { %548 = vmatprep.subr.bf16.mxu0 %v1576_v6  ;;  %654 = vmatprep.subr.bf16.mxu1 %v1565_v4 }
  0x19   :  { %1325 = vmatmul.mubr.msk.bf16.gmra.mrb[8].mxu1 %vm84_vm0, %v1366_v11 }
  0x1a   :  { %470 = vmatprep.mubr.bf16.mxu1 %v1485_v16 }
  0x1b   :  { %549 = vmatpush1.bf16.msra.mxu0 %v1586_v8 }
  0x1c   :  { %550 = vmatprep.subr.bf16.mxu0 %v1596_v10 }
  0x1f   :  { %551 = vmatpush1.bf16.msra.mxu0 %v1604_v12 }
  0x20   :  { %552 = vmatprep.subr.bf16.mxu0 %v1610_v13 }
  0x23   :  { %553 = vmatpush1.bf16.msra.mxu0 %v1623_v15 }
  0x24   :  { %762 = vmatprep.subr.bf16.mxu0 %v1565_v4 }
  0xd9   :  { %v1308_v19 = vpop.f32.mrb[0].mxu0 }
  0xda   :  { %v1651_v20 = vadd.f32 %v1308_v19, %v1235_v18  ;;  %v131_v21 = vpop.f32.mrb[1].mxu0 }
  0xdb   :  { %v1309_v22 = vpop.f32.mrb[2].mxu0  ;;  %v132_v40 = vadd.f32 %v1235_v18, %v131_v21 }
  0xdc   :  { %v1653_v23 = vadd.f32 %v1309_v22, %v1235_v18  ;;  %v134_v24 = vpop.f32.mrb[3].mxu0  ;;  %v249_v27 = vpop.f32.mrb[0].mxu1 }
  0xdd   :  { %v1655_v25 = vadd.f32 %v1235_v18, %v134_v24  ;;  %v1318_v30 = vpop.f32.mrb[1].mxu1  ;;  %v250_v39 = vadd.f32 %v1668_v36, %v249_v27 }
  0xde   :  { %v1661_v33 = vpop.f32.mrb[2].mxu1 }
  0xdf   :  { %v1319_v37 = vpop.f32.mrb[3].mxu1 }
  0xe1   :  { %v1312_v26 = vpop.f32.mrb[4].mxu0 }
  0xe2   :  { %v1657_v28 = vadd.f32 %v1312_v26, %v1235_v18  ;;  %v147_v29 = vpop.f32.mrb[5].mxu0 }
  0xe3   :  { %v1659_v31 = vadd.f32 %v1235_v18, %v147_v29  ;;  %v1313_v32 = vpop.f32.mrb[6].mxu0 }
  0xe4   :  { %v1663_v34 = vadd.f32 %v1313_v32, %v1235_v18  ;;  %v150_v35 = vpop.f32.mrb[7].mxu0  ;;  %v1698_v22 = vpop.f32.mrb[4].mxu1 }
  0xe5   :  { %v1670_v38 = vadd.f32 %v1235_v18, %v150_v35  ;;  %v1322_v24 = vpop.f32.mrb[5].mxu1 }
  0xe6   :  { %v1700_v26 = vpop.f32.mrb[6].mxu1 }
  0xe7   :  { %v1323_v27 = vpop.f32.mrb[7].mxu1 }
  0xe9   :  { %v365_v41 = vpop.f32.mrb[8].mxu0 }
  0xea   :  { %v374_v42 = vadd.f32 %v365_v41, %v132_v40  ;;  %v367_v43 = vpop.f32.mrb[9].mxu0 }
  0xeb   :  { %v375_v44 = vadd.f32 %v367_v43, %v250_v39  ;;  %v369_v45 = vpop.f32.mrb[10].mxu0 }
  0xec   :  { %1371 = vtanh.f32 %v374_v42  ;;  %v370_v46 = vpop.f32.mrb[11].mxu0  ;;  %v1261_v49 = vmul.f32 -1.442695, %v374_v42  ;;  %v1702_v29 = vpop.f32.mrb[8].mxu1  ;;  %v253_v42 = vadd.f32 %v1668_v36, %v1661_v33 }
  0xed   :  { %1373 = vtanh.f32 %v375_v44  ;;  %v1262_v50 = vmul.f32 -1.442695, %v375_v44  ;;  %v1326_v30 = vpop.f32.mrb[9].mxu1 }
  0xee   :  { %1375 = vpow2.f32 %v1261_v49  ;;  %v1704_v32 = vpop.f32.mrb[10].mxu1  ;;  %v258_v30 = vadd.f32 %v1668_v36, %v1698_v22 }
  0xef   :  { %1377 = vpow2.f32 %v1262_v50  ;;  %v1327_v35 = vpop.f32.mrb[11].mxu1 }
  0xf6   :  { %v1372_v47 = vpop.eup %1371 }
  0xf7   :  { %392 = vrot.lane.b32.xlu0 %v1372_v47, %s1487_s26  ;;  %v1374_v48 = vpop.eup %1373 }
  0xf8   :  { %v1376_v51 = vpop.eup %1375 }
  0xf9   :  { %v383_v52 = vadd.f32 1.0, %v1376_v51  ;;  %v1378_v53 = vpop.eup %1377 }
  0xfa   :  { %v384_v54 = vadd.f32 1.0, %v1378_v53 }
  0xfb   :  { %403 = vrot.lane.b32.xlu0 %v1374_v48, %s1487_s26  ;;  %1379 = vrcp.f32 %v383_v52 }
  0xfc   :  { %1381 = vrcp.f32 %v384_v54 }
 0x105   :  { %v1380_v55 = vpop.eup %1379 }
 0x106   :  { %v1382_v58 = vpop.eup %1381  ;;  %v390_v61 = vmul.f32 0.0, %v1380_v55 }
 0x107   :  { %v401_v0 = vmul.f32 0.0, %v1382_v58 }
 0x169   :  { %v393_v56 = vpop.permute.xlu0 %392 }
 0x16a   :  { %v395_v57 = vmul.f32 %v1380_v55, %v393_v56 }
 0x16c   :  { %397 = vrot.lane.b32.xlu1 %v395_v57, %s1487_s26 }
 0x16d   :  { %v404_v59 = vpop.permute.xlu0 %403 }
 0x16e   :  { %v406_v60 = vmul.f32 %v1382_v58, %v404_v59 }
 0x170   :  { %408 = vrot.lane.b32.xlu1 %v406_v60, %s1487_s26 }
 0x1de   :  { %v398_v62 = vpop.permute.xlu1 %397 }
 0x1df   :  { %v1677_v63 = vadd.f32 %v398_v62, %v390_v61 }
 0x1e1   :  { %1383 = vtanh.f32 %v1677_v63 }
 0x1e2   :  { %v409_v2 = vpop.permute.xlu1 %408 }
 0x1e3   :  { %v1680_v3 = vadd.f32 %v409_v2, %v401_v0 }
 0x1e5   :  { %1385 = vtanh.f32 %v1680_v3 }
 0x1eb   :  { %v1384_v9 = vpop.eup %1383 }
 0x1ec   :  { %414 = vrot.lane.b32.xlu0 %v1384_v9, %s1487_s26 }
 0x1ef   :  { %v1386_v14 = vpop.eup %1385 }
 0x1f0   :  { %420 = vrot.lane.b32.xlu1 %v1386_v14, %s1487_s26 }
 0x25e   :  { %v415_v17 = vpop.permute.xlu0 %414 }
 0x25f   :  { %v417_v18 = vmul.f32 %v1380_v55, %v415_v17 }
 0x261   :  { %425 = vrot.lane.b32.xlu0 %v417_v18, %s1487_s26 }
 0x262   :  { %v421_v19 = vpop.permute.xlu1 %420 }
 0x263   :  { %v423_v21 = vmul.f32 %v1382_v58, %v421_v19 }
 0x265   :  { %429 = vrot.lane.b32.xlu1 %v423_v21, %s1488_s30 }
 0x2d3   :  { %v426_v37 = vpop.permute.xlu0 %425 }
 0x2d7   :  { %v430_v39 = vpop.permute.xlu1 %429 }
 0x2d8   :  { %v433_v40 = vsel %vm432_vm2, %v426_v37, %v430_v39 }
 0x2d9   :  { %v434_v41 = vpack.c.bf16 %v433_v40, %v433_v40 }
 0x2db   :  { %1263 = vmatmul.mubr.msk.bf16.vlgmr.msra.gmra.mrb[12].mxu1 %vm327_vm3, %v434_v41 }
 0x2dc   :  { %655 = vmatpush1.bf16.msra.mxu1 %v1570_v5  ;;  %686 = vmatprep.mubr.bf16.mxu1 %v1485_v16 }
 0x2dd   :  { %656 = vmatprep.subr.bf16.mxu1 %v1576_v6 }
 0x2e0   :  { %657 = vmatpush1.bf16.msra.mxu1 %v1586_v8 }
 0x2e1   :  { %658 = vmatprep.subr.bf16.mxu1 %v1596_v10 }
 0x2e4   :  { %659 = vmatpush1.bf16.msra.mxu1 %v1604_v12 }
 0x2e5   :  { %660 = vmatprep.subr.bf16.mxu1 %v1610_v13 }
 0x2e8   :  { %661 = vmatpush1.bf16.msra.mxu1 %v1623_v15 }
 0x2e9   :  { %870 = vmatprep.subr.bf16.mxu1 %v1565_v4 }
 0x3ae   :  { %v472_v43 = vpop.f32.mrb[12].mxu1 }
 0x3af   :  { %v483_v44 = vadd.f32 %v472_v43, %v1655_v25  ;;  %v474_v45 = vpop.f32.mrb[13].mxu1 }
 0x3b0   :  { %v484_v46 = vadd.f32 %v474_v45, %v253_v42  ;;  %v476_v47 = vpop.f32.mrb[14].mxu1 }
 0x3b1   :  { %1387 = vtanh.f32 %v483_v44  ;;  %v477_v48 = vpop.f32.mrb[15].mxu1  ;;  %v1264_v51 = vmul.f32 -1.442695, %v483_v44 }
 0x3b2   :  { %1389 = vtanh.f32 %v484_v46  ;;  %v1265_v52 = vmul.f32 -1.442695, %v484_v46 }
 0x3b3   :  { %1391 = vpow2.f32 %v1264_v51 }
 0x3b4   :  { %1393 = vpow2.f32 %v1265_v52 }
 0x3bb   :  { %v1388_v49 = vpop.eup %1387 }
 0x3bc   :  { %v1390_v50 = vpop.eup %1389  ;;  %501 = vrot.lane.b32.xlu0 %v1388_v49, %s1487_s26 }
 0x3bd   :  { %512 = vrot.lane.b32.xlu1 %v1390_v50, %s1487_s26  ;;  %v1392_v33 = vpop.eup %1391 }
 0x3be   :  { %v1394_v53 = vpop.eup %1393  ;;  %v492_v54 = vadd.f32 1.0, %v1392_v33 }
 0x3bf   :  { %v493_v25 = vadd.f32 1.0, %v1394_v53 }
 0x3c0   :  { %1395 = vrcp.f32 %v492_v54 }
 0x3c1   :  { %1397 = vrcp.f32 %v493_v25 }
 0x3ca   :  { %v1396_v55 = vpop.eup %1395 }
 0x3cb   :  { %v1398_v57 = vpop.eup %1397  ;;  %v499_v61 = vmul.f32 %v1396_v55, %v1677_v63 }
 0x3cc   :  { %v510_v0 = vmul.f32 %v1398_v57, %v1680_v3 }
 0x42e   :  { %v502_v56 = vpop.permute.xlu0 %501 }
 0x42f   :  { %v504_v58 = vmul.f32 %v1396_v55, %v502_v56  ;;  %v513_v59 = vpop.permute.xlu1 %512 }
 0x430   :  { %v515_v60 = vmul.f32 %v1398_v57, %v513_v59 }
 0x431   :  { %506 = vrot.lane.b32.xlu0 %v504_v58, %s1487_s26 }
 0x432   :  { %517 = vrot.lane.b32.xlu1 %v515_v60, %s1487_s26 }
 0x4a3   :  { %v507_v62 = vpop.permute.xlu0 %506 }
 0x4a4   :  { %v509_v2 = vadd.f32 %v507_v62, %v499_v61  ;;  %v518_v7 = vpop.permute.xlu1 %517 }
 0x4a5   :  { %v520_v9 = vadd.f32 %v518_v7, %v510_v0 }
 0x4a6   :  { %1399 = vtanh.f32 %v509_v2 }
 0x4a7   :  { %1401 = vtanh.f32 %v520_v9 }
 0x4b0   :  { %v1400_v11 = vpop.eup %1399 }
 0x4b1   :  { %v1402_v14 = vpop.eup %1401  ;;  %523 = vrot.lane.b32.xlu0 %v1400_v11, %s1487_s26 }
 0x4b2   :  { %529 = vrot.lane.b32.xlu1 %v1402_v14, %s1487_s26 }
 0x523   :  { %v524_v17 = vpop.permute.xlu0 %523 }
 0x524   :  { %v526_v18 = vmul.f32 %v1396_v55, %v524_v17  ;;  %v530_v19 = vpop.permute.xlu1 %529  ;;  %v261_v17 = vadd.f32 %v1668_v36, %v1700_v26 }
 0x525   :  { %v532_v21 = vmul.f32 %v1398_v57, %v530_v19 }
 0x526   :  { %534 = vrot.lane.b32.xlu0 %v526_v18, %s1487_s26 }
 0x527   :  { %538 = vrot.lane.b32.xlu1 %v532_v21, %s1488_s30 }
 0x598   :  { %v535_v63 = vpop.permute.xlu0 %534 }
 0x599   :  { %v539_v3 = vpop.permute.xlu1 %538 }
 0x59a   :  { %v541_v24 = vsel %vm432_vm2, %v535_v63, %v539_v3 }
 0x59b   :  { %v542_v27 = vpack.c.bf16 %v541_v24, %v541_v24 }
 0x59d   :  { %1266 = vmatmul.mubr.msk.bf16.vlgmr.msra.gmra.mrb[12].mxu0 %vm327_vm3, %v542_v27 }
 0x59e   :  { %763 = vmatpush1.bf16.msra.mxu0 %v1570_v5  ;;  %794 = vmatprep.mubr.bf16.mxu0 %v1485_v16 }
 0x59f   :  { %764 = vmatprep.subr.bf16.mxu0 %v1576_v6 }
 0x5a2   :  { %765 = vmatpush1.bf16.msra.mxu0 %v1586_v8 }
 0x5a3   :  { %766 = vmatprep.subr.bf16.mxu0 %v1596_v10 }
 0x5a6   :  { %767 = vmatpush1.bf16.msra.mxu0 %v1604_v12 }
 0x5a7   :  { %768 = vmatprep.subr.bf16.mxu0 %v1610_v13 }
 0x5aa   :  { %769 = vmatpush1.bf16.msra.mxu0 %v1623_v15 }
 0x5ab   :  { %978 = vmatprep.subr.bf16.mxu0 %v1565_v4 }
 0x670   :  { %v580_v35 = vpop.f32.mrb[12].mxu0 }
 0x671   :  { %v591_v37 = vadd.f32 %v580_v35, %v1651_v20  ;;  %v582_v39 = vpop.f32.mrb[13].mxu0 }
 0x672   :  { %v592_v40 = vadd.f32 %v582_v39, %v258_v30  ;;  %v584_v41 = vpop.f32.mrb[14].mxu0 }
 0x673   :  { %1403 = vtanh.f32 %v591_v37  ;;  %v585_v42 = vpop.f32.mrb[15].mxu0  ;;  %v1267_v45 = vmul.f32 -1.442695, %v591_v37 }
 0x674   :  { %1405 = vtanh.f32 %v592_v40  ;;  %v1268_v46 = vmul.f32 -1.442695, %v592_v40 }
 0x675   :  { %1407 = vpow2.f32 %v1267_v45 }
 0x676   :  { %1409 = vpow2.f32 %v1268_v46 }
 0x67d   :  { %v1404_v43 = vpop.eup %1403 }
 0x67e   :  { %v1406_v44 = vpop.eup %1405  ;;  %609 = vrot.lane.b32.xlu0 %v1404_v43, %s1487_s26 }
 0x67f   :  { %620 = vrot.lane.b32.xlu1 %v1406_v44, %s1487_s26  ;;  %v1408_v22 = vpop.eup %1407 }
 0x680   :  { %v1410_v47 = vpop.eup %1409  ;;  %v600_v48 = vadd.f32 1.0, %v1408_v22 }
 0x681   :  { %v601_v20 = vadd.f32 1.0, %v1410_v47 }
 0x682   :  { %1411 = vrcp.f32 %v600_v48 }
 0x683   :  { %1413 = vrcp.f32 %v601_v20 }
 0x68c   :  { %v1412_v49 = vpop.eup %1411 }
 0x68d   :  { %v1414_v51 = vpop.eup %1413  ;;  %v607_v54 = vmul.f32 %v1412_v49, %v509_v2 }
 0x68e   :  { %v618_v55 = vmul.f32 %v1414_v51, %v520_v9 }
 0x6f0   :  { %v610_v50 = vpop.permute.xlu0 %609 }
 0x6f1   :  { %v612_v52 = vmul.f32 %v1412_v49, %v610_v50  ;;  %v621_v33 = vpop.permute.xlu1 %620 }
 0x6f2   :  { %v623_v53 = vmul.f32 %v1414_v51, %v621_v33 }
 0x6f3   :  { %614 = vrot.lane.b32.xlu0 %v612_v52, %s1487_s26 }
 0x6f4   :  { %625 = vrot.lane.b32.xlu1 %v623_v53, %s1487_s26 }
 0x765   :  { %v615_v25 = vpop.permute.xlu0 %614 }
 0x766   :  { %v617_v56 = vadd.f32 %v615_v25, %v607_v54  ;;  %v626_v57 = vpop.permute.xlu1 %625 }
 0x767   :  { %v628_v58 = vadd.f32 %v626_v57, %v618_v55 }
 0x768   :  { %1415 = vtanh.f32 %v617_v56 }
 0x769   :  { %1417 = vtanh.f32 %v628_v58 }
 0x772   :  { %v1416_v59 = vpop.eup %1415 }
 0x773   :  { %v1418_v60 = vpop.eup %1417  ;;  %631 = vrot.lane.b32.xlu0 %v1416_v59, %s1487_s26 }
 0x774   :  { %637 = vrot.lane.b32.xlu1 %v1418_v60, %s1487_s26 }
 0x7e5   :  { %v632_v61 = vpop.permute.xlu0 %631 }
 0x7e6   :  { %v634_v62 = vmul.f32 %v1412_v49, %v632_v61  ;;  %v638_v0 = vpop.permute.xlu1 %637 }
 0x7e7   :  { %v640_v7 = vmul.f32 %v1414_v51, %v638_v0 }
 0x7e8   :  { %642 = vrot.lane.b32.xlu0 %v634_v62, %s1487_s26 }
 0x7e9   :  { %646 = vrot.lane.b32.xlu1 %v640_v7, %s1488_s30 }
 0x85a   :  { %v643_v2 = vpop.permute.xlu0 %642 }
 0x85b   :  { %v647_v9 = vpop.permute.xlu1 %646 }
 0x85c   :  { %v649_v11 = vsel %vm432_vm2, %v643_v2, %v647_v9 }
 0x85d   :  { %v650_v14 = vpack.c.bf16 %v649_v11, %v649_v11 }
 0x85f   :  { %1269 = vmatmul.mubr.msk.bf16.vlgmr.msra.gmra.mrb[16].mxu1 %vm327_vm3, %v650_v14 }
 0x860   :  { %871 = vmatpush1.bf16.msra.mxu1 %v1570_v5  ;;  %902 = vmatprep.mubr.bf16.mxu1 %v1485_v16 }
 0x861   :  { %872 = vmatprep.subr.bf16.mxu1 %v1576_v6 }
 0x864   :  { %873 = vmatpush1.bf16.msra.mxu1 %v1586_v8 }
 0x865   :  { %874 = vmatprep.subr.bf16.mxu1 %v1596_v10 }
 0x868   :  { %875 = vmatpush1.bf16.msra.mxu1 %v1604_v12 }
 0x869   :  { %876 = vmatprep.subr.bf16.mxu1 %v1610_v13 }
 0x86c   :  { %877 = vmatpush1.bf16.msra.mxu1 %v1623_v15 }
 0x86d   :  { %1054 = vmatprep.subr.bf16.mxu1 %v1565_v4 }
 0x932   :  { %v688_v18 = vpop.f32.mrb[16].mxu1 }
 0x933   :  { %v699_v19 = vadd.f32 %v688_v18, %v1653_v23  ;;  %v690_v21 = vpop.f32.mrb[17].mxu1 }
 0x934   :  { %v700_v63 = vadd.f32 %v690_v21, %v261_v17  ;;  %v692_v3 = vpop.f32.mrb[18].mxu1 }
 0x935   :  { %1419 = vtanh.f32 %v699_v19  ;;  %v693_v24 = vpop.f32.mrb[19].mxu1  ;;  %v1270_v35 = vmul.f32 -1.442695, %v699_v19 }
 0x936   :  { %1421 = vtanh.f32 %v700_v63  ;;  %v1271_v4 = vmul.f32 -1.442695, %v700_v63 }
 0x937   :  { %1423 = vpow2.f32 %v1270_v35 }
 0x938   :  { %1425 = vpow2.f32 %v1271_v4 }
 0x93f   :  { %v1420_v27 = vpop.eup %1419 }
 0x940   :  { %v1422_v30 = vpop.eup %1421  ;;  %717 = vrot.lane.b32.xlu0 %v1420_v27, %s1487_s26 }
 0x941   :  { %728 = vrot.lane.b32.xlu1 %v1422_v30, %s1487_s26  ;;  %v1424_v26 = vpop.eup %1423 }
 0x942   :  { %v1426_v37 = vpop.eup %1425  ;;  %v708_v39 = vadd.f32 1.0, %v1424_v26 }
 0x943   :  { %v709_v23 = vadd.f32 1.0, %v1426_v37 }
 0x944   :  { %1427 = vrcp.f32 %v708_v39 }
 0x945   :  { %1429 = vrcp.f32 %v709_v23 }
 0x94e   :  { %v1428_v40 = vpop.eup %1427 }
 0x94f   :  { %v1430_v42 = vpop.eup %1429  ;;  %v715_v46 = vmul.f32 %v1428_v40, %v617_v56 }
 0x950   :  { %v726_v47 = vmul.f32 %v1430_v42, %v628_v58  ;;  %v266_v58 = vadd.f32 %v1668_v36, %v1702_v29 }
 0x9b2   :  { %v718_v41 = vpop.permute.xlu0 %717 }
 0x9b3   :  { %v720_v43 = vmul.f32 %v1428_v40, %v718_v41  ;;  %v729_v44 = vpop.permute.xlu1 %728 }
 0x9b4   :  { %v731_v45 = vmul.f32 %v1430_v42, %v729_v44 }
 0x9b5   :  { %722 = vrot.lane.b32.xlu0 %v720_v43, %s1487_s26 }
 0x9b6   :  { %733 = vrot.lane.b32.xlu1 %v731_v45, %s1487_s26 }
 0xa27   :  { %v723_v22 = vpop.permute.xlu0 %722 }
 0xa28   :  { %v725_v48 = vadd.f32 %v723_v22, %v715_v46  ;;  %v734_v20 = vpop.permute.xlu1 %733 }
 0xa29   :  { %v736_v49 = vadd.f32 %v734_v20, %v726_v47 }
 0xa2a   :  { %1431 = vtanh.f32 %v725_v48 }
 0xa2b   :  { %1433 = vtanh.f32 %v736_v49 }
 0xa34   :  { %v1432_v50 = vpop.eup %1431 }
 0xa35   :  { %v1434_v51 = vpop.eup %1433  ;;  %739 = vrot.lane.b32.xlu0 %v1432_v50, %s1487_s26 }
 0xa36   :  { %745 = vrot.lane.b32.xlu1 %v1434_v51, %s1487_s26 }
 0xaa7   :  { %v740_v52 = vpop.permute.xlu0 %739 }
 0xaa8   :  { %v742_v33 = vmul.f32 %v1428_v40, %v740_v52  ;;  %v746_v53 = vpop.permute.xlu1 %745 }
 0xaa9   :  { %v748_v54 = vmul.f32 %v1430_v42, %v746_v53 }
 0xaaa   :  { %750 = vrot.lane.b32.xlu0 %v742_v33, %s1487_s26 }
 0xaab   :  { %754 = vrot.lane.b32.xlu1 %v748_v54, %s1488_s30 }
 0xb1c   :  { %v751_v25 = vpop.permute.xlu0 %750 }
 0xb1d   :  { %v755_v55 = vpop.permute.xlu1 %754 }
 0xb1e   :  { %v757_v56 = vsel %vm432_vm2, %v751_v25, %v755_v55 }
 0xb1f   :  { %v758_v57 = vpack.c.bf16 %v757_v56, %v757_v56 }
 0xb21   :  { %1272 = vmatmul.mubr.msk.bf16.vlgmr.msra.gmra.mrb[16].mxu0 %vm327_vm3, %v758_v57 }
 0xb22   :  { %979 = vmatpush1.bf16.msra.mxu0 %v1570_v5  ;;  %1010 = vmatprep.mubr.bf16.mxu0 %v1485_v16 }
 0xb23   :  { %980 = vmatprep.subr.bf16.mxu0 %v1576_v6 }
 0xb26   :  { %981 = vmatpush1.bf16.msra.mxu0 %v1586_v8 }
 0xb27   :  { %982 = vmatprep.subr.bf16.mxu0 %v1596_v10 }
 0xb2a   :  { %983 = vmatpush1.bf16.msra.mxu0 %v1604_v12 }
 0xb2b   :  { %984 = vmatprep.subr.bf16.mxu0 %v1610_v13 }
 0xb2e   :  { %985 = vmatpush1.bf16.msra.mxu0 %v1623_v15 }
 0xb2f   :  { %1328 = vmatprep.subr.bf16.mxu0 %v1483_v1 }
 0xbf4   :  { %v796_v59 = vpop.f32.mrb[16].mxu0 }
 0xbf5   :  { %v807_v60 = vadd.f32 %v796_v59, %v1659_v31  ;;  %v798_v61 = vpop.f32.mrb[17].mxu0 }
 0xbf6   :  { %v808_v62 = vadd.f32 %v798_v61, %v266_v58  ;;  %v800_v0 = vpop.f32.mrb[18].mxu0 }
 0xbf7   :  { %1435 = vtanh.f32 %v807_v60  ;;  %v801_v7 = vpop.f32.mrb[19].mxu0  ;;  %v1273_v11 = vmul.f32 -1.442695, %v807_v60 }
 0xbf8   :  { %1437 = vtanh.f32 %v808_v62  ;;  %v1274_v14 = vmul.f32 -1.442695, %v808_v62 }
 0xbf9   :  { %1439 = vpow2.f32 %v1273_v11 }
 0xbfa   :  { %1441 = vpow2.f32 %v1274_v14 }
 0xc01   :  { %v1436_v2 = vpop.eup %1435 }
 0xc02   :  { %v1438_v9 = vpop.eup %1437  ;;  %825 = vrot.lane.b32.xlu0 %v1436_v2, %s1487_s26 }
 0xc03   :  { %836 = vrot.lane.b32.xlu1 %v1438_v9, %s1487_s26  ;;  %v1440_v29 = vpop.eup %1439 }
 0xc04   :  { %v1442_v17 = vpop.eup %1441  ;;  %v816_v18 = vadd.f32 1.0, %v1440_v29 }
 0xc05   :  { %v817_v31 = vadd.f32 1.0, %v1442_v17 }
 0xc06   :  { %1443 = vrcp.f32 %v816_v18 }
 0xc07   :  { %1445 = vrcp.f32 %v817_v31 }
 0xc10   :  { %v1444_v19 = vpop.eup %1443 }
 0xc11   :  { %v1446_v63 = vpop.eup %1445  ;;  %v823_v30 = vmul.f32 %v1444_v19, %v725_v48  ;;  %v269_v48 = vadd.f32 %v1668_v36, %v1704_v32 }
 0xc12   :  { %v834_v4 = vmul.f32 %v1446_v63, %v736_v49 }
 0xc74   :  { %v826_v21 = vpop.permute.xlu0 %825 }
 0xc75   :  { %v828_v3 = vmul.f32 %v1444_v19, %v826_v21  ;;  %v837_v24 = vpop.permute.xlu1 %836 }
 0xc76   :  { %v839_v27 = vmul.f32 %v1446_v63, %v837_v24 }
 0xc77   :  { %830 = vrot.lane.b32.xlu0 %v828_v3, %s1487_s26 }
 0xc78   :  { %841 = vrot.lane.b32.xlu1 %v839_v27, %s1487_s26 }
 0xce9   :  { %v831_v35 = vpop.permute.xlu0 %830 }
 0xcea   :  { %v833_v26 = vadd.f32 %v831_v35, %v823_v30  ;;  %v842_v37 = vpop.permute.xlu1 %841 }
 0xceb   :  { %v844_v39 = vadd.f32 %v842_v37, %v834_v4 }
 0xcec   :  { %1447 = vtanh.f32 %v833_v26 }
 0xced   :  { %1449 = vtanh.f32 %v844_v39 }
 0xcf6   :  { %v1448_v23 = vpop.eup %1447 }
 0xcf7   :  { %v1450_v40 = vpop.eup %1449  ;;  %847 = vrot.lane.b32.xlu0 %v1448_v23, %s1487_s26 }
 0xcf8   :  { %853 = vrot.lane.b32.xlu1 %v1450_v40, %s1487_s26 }
 0xd69   :  { %v848_v41 = vpop.permute.xlu0 %847 }
 0xd6a   :  { %v850_v42 = vmul.f32 %v1444_v19, %v848_v41  ;;  %v854_v43 = vpop.permute.xlu1 %853 }
 0xd6b   :  { %v856_v44 = vmul.f32 %v1446_v63, %v854_v43 }
 0xd6c   :  { %858 = vrot.lane.b32.xlu0 %v850_v42, %s1487_s26 }
 0xd6d   :  { %862 = vrot.lane.b32.xlu1 %v856_v44, %s1488_s30 }
 0xdde   :  { %v859_v45 = vpop.permute.xlu0 %858 }
 0xddf   :  { %v863_v46 = vpop.permute.xlu1 %862 }
 0xde0   :  { %v865_v22 = vsel %vm432_vm2, %v859_v45, %v863_v46 }
 0xde1   :  { %v866_v47 = vpack.c.bf16 %v865_v22, %v865_v22 }
 0xde3   :  { %1275 = vmatmul.mubr.msk.bf16.vlgmr.msra.gmra.mrb[20].mxu1 %vm327_vm3, %v866_v47 }
 0xde4   :  { %1055 = vmatpush1.bf16.msra.mxu1 %v1570_v5  ;;  %1086 = vmatprep.mubr.bf16.mxu1 %v1485_v16 }
 0xde5   :  { %1056 = vmatprep.subr.bf16.mxu1 %v1576_v6 }
 0xde8   :  { %1057 = vmatpush1.bf16.msra.mxu1 %v1586_v8 }
 0xde9   :  { %1058 = vmatprep.subr.bf16.mxu1 %v1596_v10 }
 0xdec   :  { %1059 = vmatpush1.bf16.msra.mxu1 %v1604_v12 }
 0xded   :  { %1060 = vmatprep.subr.bf16.mxu1 %v1610_v13 }
 0xdf0   :  { %1061 = vmatpush1.bf16.msra.mxu1 %v1623_v15 }
 0xeb6   :  { %v904_v20 = vpop.f32.mrb[20].mxu1 }
 0xeb7   :  { %v915_v5 = vadd.f32 %v904_v20, %v1670_v38  ;;  %v906_v49 = vpop.f32.mrb[21].mxu1 }
 0xeb8   :  { %v916_v16 = vadd.f32 %v906_v49, %v269_v48  ;;  %v908_v50 = vpop.f32.mrb[22].mxu1 }
 0xeb9   :  { %1451 = vtanh.f32 %v915_v5  ;;  %v909_v6 = vpop.f32.mrb[23].mxu1  ;;  %v1276_v12 = vmul.f32 -1.442695, %v915_v5 }
 0xeba   :  { %1453 = vtanh.f32 %v916_v16  ;;  %v1277_v13 = vmul.f32 -1.442695, %v916_v16 }
 0xebb   :  { %1455 = vpow2.f32 %v1276_v12 }
 0xebc   :  { %1457 = vpow2.f32 %v1277_v13  ;;  %v1367_v13 = vld [vmem:[%s1875_s7] sm:$0xff]  }
 0xec3   :  { %v1452_v8 = vpop.eup %1451 }
 0xec4   :  { %v1454_v10 = vpop.eup %1453  ;;  %933 = vrot.lane.b32.xlu0 %v1452_v8, %s1487_s26 }
 0xec5   :  { %944 = vrot.lane.b32.xlu1 %v1454_v10, %s1487_s26  ;;  %v1456_v15 = vpop.eup %1455 }
 0xec6   :  { %v1458_v36 = vpop.eup %1457  ;;  %v924_v32 = vadd.f32 1.0, %v1456_v15  ;;  %v1368_v15 = vld [vmem:[%s1875_s7 + $0x8] sm:$0xff]  }
 0xec7   :  { %v925_v38 = vadd.f32 1.0, %v1458_v36  ;;  %v1369_v36 = vld [vmem:[%s1875_s7 + $0x10] sm:$0xff]  }
 0xec8   :  { %1459 = vrcp.f32 %v924_v32 }
 0xec9   :  { %1461 = vrcp.f32 %v925_v38  ;;  %v1370_v38 = vld [vmem:[%s1875_s7 + $0x18] sm:$0xff]  }
 0xed2   :  { %v1460_v51 = vpop.eup %1459 }
 0xed3   :  { %v1462_v33 = vpop.eup %1461  ;;  %v931_v55 = vmul.f32 %v1460_v51, %v833_v26 }
 0xed4   :  { %v942_v57 = vmul.f32 %v1462_v33, %v844_v39 }
 0xf36   :  { %v934_v52 = vpop.permute.xlu0 %933 }
 0xf37   :  { %v936_v53 = vmul.f32 %v1460_v51, %v934_v52  ;;  %v945_v54 = vpop.permute.xlu1 %944 }
 0xf38   :  { %v947_v25 = vmul.f32 %v1462_v33, %v945_v54 }
 0xf39   :  { %938 = vrot.lane.b32.xlu0 %v936_v53, %s1487_s26 }
 0xf3a   :  { %949 = vrot.lane.b32.xlu1 %v947_v25, %s1487_s26  ;;  %v1282_v25 = vld [vmem:[%s1877_s8] ss:$0 sm:$0xff] }
 0xfab   :  { %v939_v56 = vpop.permute.xlu0 %938 }
 0xfac   :  { %v941_v58 = vadd.f32 %v939_v56, %v931_v55  ;;  %v950_v59 = vpop.permute.xlu1 %949 }
 0xfad   :  { %v952_v60 = vadd.f32 %v950_v59, %v942_v57  ;;  %v1288_v59 = vld [vmem:[%s1878_s9] ss:$0 sm:$0xff] }
 0xfae   :  { %1463 = vtanh.f32 %v941_v58 }
 0xfaf   :  { %1465 = vtanh.f32 %v952_v60 }
 0xfb8   :  { %v1464_v61 = vpop.eup %1463 }
 0xfb9   :  { %v1466_v62 = vpop.eup %1465  ;;  %955 = vrot.lane.b32.xlu0 %v1464_v61, %s1487_s26 }
 0xfba   :  { %961 = vrot.lane.b32.xlu1 %v1466_v62, %s1487_s26 }
0x102b   :  { %v956_v0 = vpop.permute.xlu0 %955 }
0x102c   :  { %v958_v7 = vmul.f32 %v1460_v51, %v956_v0  ;;  %v962_v2 = vpop.permute.xlu1 %961 }
0x102d   :  { %v964_v9 = vmul.f32 %v1462_v33, %v962_v2 }
0x102e   :  { %966 = vrot.lane.b32.xlu0 %v958_v7, %s1487_s26 }
0x102f   :  { %970 = vrot.lane.b32.xlu1 %v964_v9, %s1488_s30 }
0x10a0   :  { %v967_v11 = vpop.permute.xlu0 %966 }
0x10a1   :  { %v1817_v14 = vpop.permute.xlu1 %970 }
0x10a2   :  { %v973_v29 = vsel %vm432_vm2, %v967_v11, %v1817_v14 }
0x10a3   :  { %v974_v17 = vpack.c.bf16 %v973_v29, %v973_v29 }
0x10a5   :  { %1278 = vmatmul.mubr.msk.bf16.vlgmr.msra.gmra.mrb[20].mxu0 %vm327_vm3, %v974_v17 }
0x10a6   :  { %1336 = vmatprep.mubr.msk.bf16.mxu0 %vm1484_vm1, %v1483_v1  ;;  %1329 = vmatpush3.bf16.msra.mxu0 %v1367_v13 }
0x10a7   :  { %1330 = vmatprep.subr.bf16.mxu0 %v1483_v1 }
0x10aa   :  { %1331 = vmatpush3.bf16.msra.mxu0 %v1368_v15 }
0x10ab   :  { %1332 = vmatprep.subr.bf16.mxu0 %v1483_v1 }
0x10ae   :  { %1333 = vmatpush3.bf16.msra.mxu0 %v1369_v36 }
0x10af   :  { %1334 = vmatprep.subr.bf16.mxu0 %v1483_v1  ;;  %v16_v1 = vstv %s1876_s10 }
0x10b0   :  { %17 = vst [vmem:[#allocation4] sm:$0x1] %v16_v1 }
0x10b2   :  { %1335 = vmatpush3.bf16.msra.mxu0 %v1370_v38 }
0x10b7   :  { %v1289_v7 = vld [vmem:[#allocation4] ss:$0 sm:$0xff] }
0x1178   :  { %v1012_v18 = vpop.f32.mrb[20].mxu0 }
0x1179   :  { %v1020_v31 = vadd.f32 %v1012_v18, %v1657_v28  ;;  %v1014_v19 = vpop.f32.mrb[21].mxu0 }
0x117a   :  { %v1015_v21 = vpop.f32.mrb[22].mxu0 }
0x117b   :  { %1467 = vtanh.f32 %v1020_v31  ;;  %v1016_v63 = vpop.f32.mrb[23].mxu0  ;;  %v1279_v24 = vmul.f32 -1.442695, %v1020_v31 }
0x117d   :  { %1469 = vpow2.f32 %v1279_v24 }
0x1185   :  { %v1468_v3 = vpop.eup %1467 }
0x1186   :  { %1030 = vrot.lane.b32.xlu0 %v1468_v3, %s1487_s26 }
0x1187   :  { %v1470_v27 = vpop.eup %1469 }
0x1188   :  { %v1025_v30 = vadd.f32 1.0, %v1470_v27 }
0x118a   :  { %1471 = vrcp.f32 %v1025_v30 }
0x1194   :  { %v1472_v35 = vpop.eup %1471 }
0x1195   :  { %v1028_v37 = vmul.f32 %v1472_v35, %v941_v58 }
0x11f8   :  { %v1031_v4 = vpop.permute.xlu0 %1030 }
0x11f9   :  { %v1033_v26 = vmul.f32 %v1472_v35, %v1031_v4 }
0x11fb   :  { %1035 = vrot.lane.b32.xlu1 %v1033_v26, %s1487_s26 }
0x126d   :  { %v1036_v39 = vpop.permute.xlu1 %1035 }
0x126e   :  { %v1038_v28 = vadd.f32 %v1036_v39, %v1028_v37 }
0x1270   :  { %1473 = vtanh.f32 %v1038_v28 }
0x127a   :  { %v1474_v23 = vpop.eup %1473 }
0x127b   :  { %1041 = vrot.lane.b32.xlu0 %v1474_v23, %s1487_s26 }
0x12ed   :  { %v1042_v40 = vpop.permute.xlu0 %1041 }
0x12ee   :  { %v1044_v41 = vmul.f32 %v1472_v35, %v1042_v40 }
0x12f0   :  { %1046 = vrot.lane.b32.xlu1 %v1044_v41, %s1487_s26 }
0x1362   :  { %v1047_v42 = vpop.permute.xlu1 %1046 }
0x1363   :  { %v1049_v43 = vsel %vm432_vm2, %v1047_v42, %v1817_v14 }
0x1364   :  { %v1050_v44 = vpack.c.bf16 %v1049_v43, %v1049_v43 }
0x1366   :  { %1280 = vmatmul.mubr.msk.bf16.vlgmr.msra.gmra.mrb[24].mxu1 %vm327_vm3, %v1050_v44 }
0x1439   :  { %v1088_v45 = vpop.f32.mrb[24].mxu1 }
0x143a   :  { %v1096_v46 = vadd.f32 %v1088_v45, %v1663_v34  ;;  %v1090_v22 = vpop.f32.mrb[25].mxu1 }
0x143b   :  { %v1091_v47 = vpop.f32.mrb[26].mxu1 }
0x143c   :  { %1475 = vtanh.f32 %v1096_v46  ;;  %v1092_v48 = vpop.f32.mrb[27].mxu1  ;;  %v1281_v5 = vmul.f32 -1.442695, %v1096_v46 }
0x143e   :  { %1477 = vpow2.f32 %v1281_v5 }
0x1446   :  { %v1476_v20 = vpop.eup %1475 }
0x1447   :  { %1106 = vrot.lane.b32.xlu0 %v1476_v20, %s1487_s26 }
0x1448   :  { %v1478_v49 = vpop.eup %1477 }
0x1449   :  { %v1101_v16 = vadd.f32 1.0, %v1478_v49 }
0x144b   :  { %1479 = vrcp.f32 %v1101_v16 }
0x1455   :  { %v1480_v50 = vpop.eup %1479 }
0x1456   :  { %v1104_v10 = vmul.f32 %v1480_v50, %v1038_v28 }
0x14b9   :  { %v1107_v6 = vpop.permute.xlu0 %1106 }
0x14ba   :  { %v1109_v8 = vmul.f32 %v1480_v50, %v1107_v6 }
0x14bc   :  { %1111 = vrot.lane.b32.xlu1 %v1109_v8, %s1487_s26 }
0x152e   :  { %v1112_v12 = vpop.permute.xlu1 %1111 }
0x152f   :  { %v1114_v34 = vadd.f32 %v1112_v12, %v1104_v10 }
0x1531   :  { %1481 = vtanh.f32 %v1114_v34 }
0x153b   :  { %v1482_v32 = vpop.eup %1481 }
0x153c   :  { %1117 = vrot.lane.b32.xlu0 %v1482_v32, %s1487_s26 }
0x15ae   :  { %v1118_v51 = vpop.permute.xlu0 %1117 }
0x15af   :  { %v1120_v52 = vmul.f32 %v1480_v50, %v1118_v51 }
0x15b1   :  { %1122 = vrot.lane.b32.xlu1 %v1120_v52, %s1487_s26 }
0x1623   :  { %v1123_v33 = vpop.permute.xlu1 %1122 }
0x1624   :  { %v1125_v53 = vsel %vm432_vm2, %v1123_v33, %v1817_v14 }
0x1625   :  { %v1126_v54 = vpack.c.bf16 %v1125_v53, %v1125_v53 }
0x1627   :  { %1337 = vmatmul.mubr.msk.bf16.vlgmr.msra.gmra.mrb[24].mxu0 %vm327_vm3, %v1126_v54 }
0x16fa   :  { %v1203_v55 = vpop.f32.mrb[24].mxu0 }
0x16fb   :  { %v1204_v56 = vadd.f32 %v1282_v25, %v1203_v55  ;;  %v1338_v57 = vpop.f32.mrb[25].mxu0 }
0x16fc   :  { %v1206_v58 = vpop.f32.mrb[26].mxu0 }
0x16fd   :  { %v1209_v60 = vmax.f32 %v1204_v56, 0.0  ;;  %v1339_v61 = vpop.f32.mrb[27].mxu0 }
0x16ff   :  { %v1217_v62 = vmul.f32 %v1288_v59, %v1209_v60 }
0x1701   :  { %v1218_v0 = vsel %vm432_vm2, %v1217_v62, 0.0 }
0x1702   :  { %1219 = vadd.xlane.f32.xlu0 %v1218_v0 }
0x178f   :  { %v1220_v2 = vpop.xlane.xlu0 %1219 }
0x1790   :  { %v1228_v9 = vadd.f32 %v1289_v7, %v1220_v2 }
0x1792   :  { %1230 = vst.msk [vmem:[%s1879_s11] sm:$0xff] %vm1229_vm4, %v1228_v9 }

</bundles_post_ra>
